<compile_context>
chip_gen: v7x
topology: tpu7x:2x2x1
jax: 0.10.0
libtpu: 0.0.40
codegen_flags: <defaults>
</compile_context>

<pallas_src>
import numpy as np
import jax
import jax.numpy as jnp
from jax.experimental import pallas as pl
from jax.experimental.pallas import tpu as pltpu

WINDOW_SIZE = 11
SIGMA = 1.5
C1 = 0.01 ** 2
C2 = 0.03 ** 2


# ----------------------------------------------------------------------------
# Host-side (static) weight construction.
# ----------------------------------------------------------------------------
def _gaussian_1d(window_size: int, sigma: float) -> np.ndarray:
    x = np.arange(window_size, dtype=np.float64)
    g = np.exp(-((x - window_size // 2) ** 2) / (2.0 * sigma ** 2))
    return (g / g.sum()).astype(np.float32)


def _band_matrix(n: int, g: np.ndarray) -> np.ndarray:
    """M[i, j] = g[j - i + pad]  (zero-padded 'same' 1-D convolution as matmul)."""
    win = g.shape[0]
    pad = win // 2
    idx = np.arange(n)
    diff = idx[None, :] - idx[:, None] + pad
    valid = (diff >= 0) & (diff < win)
    return np.where(valid, g[np.clip(diff, 0, win - 1)], 0.0).astype(np.float32)


def _block_diag(m: np.ndarray, reps: int) -> np.ndarray:
    return np.kron(np.eye(reps, dtype=m.dtype), m)


# ----------------------------------------------------------------------------
# Kernel.
# ----------------------------------------------------------------------------
def _l1_ssim_kernel(x_ref, y_ref, a_ref, bt_ref, l1_ref, ssim_ref):
    gb, h, lw = x_ref.shape

    a = a_ref[...]        # (H, H)    row-blur band matrix (single copy, no block-diag)
    bt = bt_ref[...]      # (LW, LW)  block-diag col-blur matrix (transposed)

    def partial_sum(m):
        # Fold an (H, LW) map into a lane-dense (8, LW) partial-sum tile.
        if h % 8 == 0:
            return jnp.sum(m.reshape(h // 8, 8, lw), axis=0)
        # Fallback for H not multiple of 8: axis-0 reduction (stays lane-dense),
        # written into sublane 0 of the tile.
        s = jnp.sum(m, axis=0, keepdims=True)                      # (1, LW)
        rows = jax.lax.broadcasted_iota(jnp.int32, (8, lw), 0)
        return jnp.where(rows == 0, jnp.broadcast_to(s, (8, lw)), 0.0)

    l1_acc = jnp.zeros((8, lw), jnp.float32)
    ssim_acc = jnp.zeros((8, lw), jnp.float32)

    # Static unroll over the small per-step plane batch; the blur weights stay
    # resident across the whole batch (and the whole grid).
    for b in range(gb):
        x = x_ref[b]      # (H, LW) f32 wide plane (lpack planes packed on lanes)
        y = y_ref[b]

        # Column (W-axis) Gaussian blur of the five SSIM operands on the MXU.
        def colblur(z):
            return jnp.dot(z, bt, preferred_element_type=jnp.float32)

        t_x = colblur(x)
        t_y = colblur(y)
        t_xx = colblur(x * x)
        t_yy = colblur(y * y)
        t_xy = colblur(x * y)

        # Lane-stack the five blurred operands -> one wide (H, 5*LW) slab and a
        # single row (H-axis) blur matmul with the plain (H, H) band matrix.
        tw = jnp.concatenate([t_x, t_y, t_xx, t_yy, t_xy], axis=1)   # (H, 5*LW)
        bw = jnp.dot(a, tw, preferred_element_type=jnp.float32)      # (H, 5*LW)

        mu_x = bw[:, 0 * lw:1 * lw]
        mu_y = bw[:, 1 * lw:2 * lw]
        e_xx = bw[:, 2 * lw:3 * lw]
        e_yy = bw[:, 3 * lw:4 * lw]
        e_xy = bw[:, 4 * lw:5 * lw]

        sigma_x = e_xx - mu_x * mu_x
        sigma_y = e_yy - mu_y * mu_y
        sigma_xy = e_xy - mu_x * mu_y

        num = (2.0 * mu_x * mu_y + C1) * (2.0 * sigma_xy + C2)
        den = (mu_x * mu_x + mu_y * mu_y + C1) * (sigma_x + sigma_y + C2)

        # EUP approximate reciprocal + one Newton refinement (~f32 accurate),
        # keeping the divide off the VALU critical path.
        r = pl.reciprocal(den, approx=True)
        r = r * (2.0 - den * r)
        ssim_map = num * r

        l1_acc = l1_acc + partial_sum(jnp.abs(x - y))
        ssim_acc = ssim_acc + partial_sum(ssim_map)

    l1_ref[0] = l1_acc
    ssim_ref[0] = ssim_acc


# ----------------------------------------------------------------------------
# pallas_call wrapper.
# ----------------------------------------------------------------------------
def _run_kernel(x, y, a, bt, *, gs, gb, h, lw, vmem_limit, single_buffer_weights):
    # Constant weights: index map is constant -> DMA'd once.  Single-buffer
    # them so their VMEM reservation is not doubled.
    weight_kwargs = (
        dict(pipeline_mode=pl.Buffered(1)) if single_buffer_weights else {})

    grid_spec = pltpu.PrefetchScalarGridSpec(
        num_scalar_prefetch=0,
        grid=(gs,),
        in_specs=[
            pl.BlockSpec((gb, h, lw), lambda i: (i, 0, 0)),
            pl.BlockSpec((gb, h, lw), lambda i: (i, 0, 0)),
            pl.BlockSpec((h, h), lambda i: (0, 0), **weight_kwargs),
            pl.BlockSpec((lw, lw), lambda i: (0, 0), **weight_kwargs),
        ],
        out_specs=[
            pl.BlockSpec((1, 8, lw), lambda i: (i, 0, 0)),
            pl.BlockSpec((1, 8, lw), lambda i: (i, 0, 0)),
        ],
    )
    return pl.pallas_call(
        _l1_ssim_kernel,
        out_shape=(
            jax.ShapeDtypeStruct((gs, 8, lw), jnp.float32),
            jax.ShapeDtypeStruct((gs, 8, lw), jnp.float32),
        ),
        grid_spec=grid_spec,
        compiler_params=pltpu.CompilerParams(
            dimension_semantics=("parallel",),
            vmem_limit_bytes=vmem_limit),
    )(x, y, a, bt)


def _choose_batch(g: int) -> int:
    """Planes per grid step (amortize per-step overhead); must divide g."""
    for gb in (8, 4, 2, 1):
        if g % gb == 0:
            return gb
    return 1


def l1_ssim_loss(y_true: jnp.ndarray, y_pred: jnp.ndarray) -> jnp.ndarray:
    """Equivalent of F.l1_loss(y_true, y_pred) + ssim(y_true, y_pred)."""
    n, c, h, w = y_true.shape
    nc = n * c

    # Lane packing: pack `lpack` planes side-by-side along lanes so each wide
    # plane is ~128 lanes.  Kept at 128 (not 256): the block-diag col-blur
    # matrix grows as (lpack*W)^2 and v5e's MXU is 128x128; revisit once the
    # roll-based separable conv replaces the dense matrices (see TODO above).
    lpack = max(1, -(-128 // w))            # ceil(128 / W)
    g = -(-nc // lpack)                      # number of wide planes (ceil)
    nc_pad = g * lpack
    pad_planes = nc_pad - nc                 # zero-padded planes (corrected below)

    gb = _choose_batch(g)                    # wide planes per grid step
    gs = g // gb
    lw = lpack * w

    def pack(z):
        z = z.reshape(nc, h, w).astype(jnp.float32)
        if pad_planes:
            z = jnp.concatenate(
                [z, jnp.zeros((pad_planes, h, w), jnp.float32)], axis=0)
        return z.reshape(g, lpack, h, w).transpose(0, 2, 1, 3).reshape(g, h, lw)

    x = pack(y_true)
    y = pack(y_pred)

    gauss = _gaussian_1d(WINDOW_SIZE, SIGMA)
    a = jnp.asarray(_band_matrix(h, gauss))                          # (H, H)
    bt = jnp.asarray(_block_diag(_band_matrix(w, gauss).T, lpack))   # (LW, LW)

    # Explicit VMEM budget (weights single-buffered, inputs/outputs double-
    # buffered, in-kernel intermediates), clamped to a safe range.
    est_vmem = 4 * (h * h + lw * lw
                    + 2 * 2 * gb * h * lw
                    + 2 * 2 * 8 * lw
                    + 16 * h * lw)
    vmem_limit = int(min(max(2 * est_vmem, 32 * 2 ** 20), 60 * 2 ** 20))

    kwargs = dict(gs=gs, gb=gb, h=h, lw=lw, vmem_limit=vmem_limit)
    try:
        l1_parts, ssim_parts = _run_kernel(
            x, y, a, bt, single_buffer_weights=True, **kwargs)
    except Exception:
        # Older JAX without BlockSpec pipeline_mode support: fall back to the
        # default (double-buffered) constant weights.
        l1_parts, ssim_parts = _run_kernel(
            x, y, a, bt, single_buffer_weights=False, **kwargs)

    total = nc * h * w
    l1_sum = jnp.sum(l1_parts)
    # Padded (all-zero) plane pairs contribute L1 == 0 and SSIM == 1 per pixel;
    # subtract their exact contribution so the mean is unbiased.
    ssim_sum = jnp.sum(ssim_parts) - float(pad_planes * h * w)
    return (l1_sum + ssim_sum) / total


# ----------------------------------------------------------------------------
# Plain-JAX reference of the same math (band-matrix blur, zero padding).
# ----------------------------------------------------------------------------
def _reference(y_true, y_pred):
    n, c, h, w = y_true.shape
    gauss = _gaussian_1d(WINDOW_SIZE, SIGMA)
    a = jnp.asarray(_band_matrix(h, gauss))
    bm = jnp.asarray(_band_matrix(w, gauss))
    x = y_true.reshape(n * c, h, w).astype(jnp.float32)
    y = y_pred.reshape(n * c, h, w).astype(jnp.float32)

    def blur(z):
        return jnp.einsum("ih,bhw,jw->bij", a, z, bm)

    mu_x, mu_y = blur(x), blur(y)
    sx = blur(x * x) - mu_x * mu_x
    sy = blur(y * y) - mu_y * mu_y
    sxy = blur(x * y) - mu_x * mu_y
    ssim_map = ((2 * mu_x * mu_y + C1) * (2 * sxy + C2)) / (
        (mu_x ** 2 + mu_y ** 2 + C1) * (sx + sy + C2))
    return jnp.mean(jnp.abs(x - y)) + jnp.mean(ssim_map)


if __name__ == "__main__":
    key = jax.random.PRNGKey(0)
    k1, k2, k3, k4 = jax.random.split(key, 4)

    # Main case: NCHW, batch=2, channels=4, 16x16 images.
    y_true = jax.random.uniform(k1, (2, 4, 16, 16), dtype=jnp.float32)
    y_pred = jax.random.uniform(k2, (2, 4, 16, 16), dtype=jnp.float32)
    out = jax.block_until_ready(l1_ssim_loss(y_true, y_pred))
    ref = _reference(y_true, y_pred)
    assert jnp.allclose(out, ref, rtol=1e-4, atol=1e-5), (out, ref)

    # Second case exercising the plane-padding path (N*C not a multiple of the
    # lane pack) and its exact SSIM correction.
    y_true2 = jax.random.uniform(k3, (1, 3, 16, 16), dtype=jnp.float32)
    y_pred2 = jax.random.uniform(k4, (1, 3, 16, 16), dtype=jnp.float32)
    out2 = jax.block_until_ready(l1_ssim_loss(y_true2, y_pred2))
    ref2 = _reference(y_true2, y_pred2)
    assert jnp.allclose(out2, ref2, rtol=1e-4, atol=1e-5), (out2, ref2)

    print("KERNEL_OK")
</pallas_src>

<mosaic_0001>
module attributes {stable_mosaic.version = 11 : i64} {
  func.func @_l1_ssim_kernel(%arg0: i32, %arg1: memref<1x16x128xf32, #tpu.memory_space<vmem>>, %arg2: memref<1x16x128xf32, #tpu.memory_space<vmem>>, %arg3: memref<16x16xf32, #tpu.memory_space<vmem>>, %arg4: memref<128x128xf32, #tpu.memory_space<vmem>>, %arg5: memref<1x8x128xf32, #tpu.memory_space<vmem>>, %arg6: memref<1x8x128xf32, #tpu.memory_space<vmem>>) attributes {dimension_semantics = [#tpu.dimension_semantics<parallel>], iteration_bounds = array<i64: 1>, scalar_prefetch = 0 : i64, scratch_operands = 0 : i64, tpu.core_type = #tpu.core_type<tc>, window_params = [{transform_indices = @transform_0, window_bounds = array<i64: 1, 16, 128>}, {transform_indices = @transform_1, window_bounds = array<i64: 1, 16, 128>}, {pipeline_mode = #tpu.pipeline_mode<synchronous>, transform_indices = @transform_2, window_bounds = array<i64: 16, 16>}, {pipeline_mode = #tpu.pipeline_mode<synchronous>, transform_indices = @transform_3, window_bounds = array<i64: 128, 128>}, {transform_indices = @transform_4, window_bounds = array<i64: 1, 8, 128>}, {transform_indices = @transform_5, window_bounds = array<i64: 1, 8, 128>}]} {
    %c0 = arith.constant 0 : index
    %c0_0 = arith.constant 0 : index
    %0 = vector.load %arg3[%c0, %c0_0] : memref<16x16xf32, #tpu.memory_space<vmem>>, vector<16x16xf32>
    %c0_1 = arith.constant 0 : index
    %c0_2 = arith.constant 0 : index
    %1 = vector.load %arg4[%c0_1, %c0_2] : memref<128x128xf32, #tpu.memory_space<vmem>>, vector<128x128xf32>
    %cst = arith.constant 0.000000e+00 : f32
    %2 = vector.broadcast %cst : f32 to vector<8x128xf32>
    %cst_3 = arith.constant 0.000000e+00 : f32
    %3 = vector.broadcast %cst_3 : f32 to vector<8x128xf32>
    %c0_4 = arith.constant 0 : index
    %c0_5 = arith.constant 0 : index
    %c0_6 = arith.constant 0 : index
    %4 = vector.load %arg1[%c0_4, %c0_5, %c0_6] : memref<1x16x128xf32, #tpu.memory_space<vmem>>, vector<1x16x128xf32>
    %5 = vector.shape_cast %4 : vector<1x16x128xf32> to vector<16x128xf32>
    %c0_7 = arith.constant 0 : index
    %c0_8 = arith.constant 0 : index
    %c0_9 = arith.constant 0 : index
    %6 = vector.load %arg2[%c0_7, %c0_8, %c0_9] : memref<1x16x128xf32, #tpu.memory_space<vmem>>, vector<1x16x128xf32>
    %7 = vector.shape_cast %6 : vector<1x16x128xf32> to vector<16x128xf32>
    %cst_10 = arith.constant dense<0.000000e+00> : vector<16x128xf32>
    %8 = tpu.matmul %5, %1, %cst_10 {dimension_numbers = #tpu.dot_dimension_numbers<[1], [0], [0], [1], [0, 0, 1, 1], [], []>} : vector<16x128xf32>, vector<128x128xf32>, vector<16x128xf32> -> vector<16x128xf32>
    %cst_11 = arith.constant dense<0.000000e+00> : vector<16x128xf32>
    %9 = tpu.matmul %7, %1, %cst_11 {dimension_numbers = #tpu.dot_dimension_numbers<[1], [0], [0], [1], [0, 0, 1, 1], [], []>} : vector<16x128xf32>, vector<128x128xf32>, vector<16x128xf32> -> vector<16x128xf32>
    %10 = arith.mulf %5, %5 : vector<16x128xf32>
    %cst_12 = arith.constant dense<0.000000e+00> : vector<16x128xf32>
    %11 = tpu.matmul %10, %1, %cst_12 {dimension_numbers = #tpu.dot_dimension_numbers<[1], [0], [0], [1], [0, 0, 1, 1], [], []>} : vector<16x128xf32>, vector<128x128xf32>, vector<16x128xf32> -> vector<16x128xf32>
    %12 = arith.mulf %7, %7 : vector<16x128xf32>
    %cst_13 = arith.constant dense<0.000000e+00> : vector<16x128xf32>
    %13 = tpu.matmul %12, %1, %cst_13 {dimension_numbers = #tpu.dot_dimension_numbers<[1], [0], [0], [1], [0, 0, 1, 1], [], []>} : vector<16x128xf32>, vector<128x128xf32>, vector<16x128xf32> -> vector<16x128xf32>
    %14 = arith.mulf %5, %7 : vector<16x128xf32>
    %cst_14 = arith.constant dense<0.000000e+00> : vector<16x128xf32>
    %15 = tpu.matmul %14, %1, %cst_14 {dimension_numbers = #tpu.dot_dimension_numbers<[1], [0], [0], [1], [0, 0, 1, 1], [], []>} : vector<16x128xf32>, vector<128x128xf32>, vector<16x128xf32> -> vector<16x128xf32>
    %16 = tpu.concatenate %8, %9, %11, %13, %15 in 1 : vector<16x128xf32>, vector<16x128xf32>, vector<16x128xf32>, vector<16x128xf32>, vector<16x128xf32> -> vector<16x640xf32>
    %cst_15 = arith.constant dense<0.000000e+00> : vector<16x640xf32>
    %17 = tpu.matmul %0, %16, %cst_15 {dimension_numbers = #tpu.dot_dimension_numbers<[1], [0], [0], [1], [0, 0, 1, 1], [], []>} : vector<16x16xf32>, vector<16x640xf32>, vector<16x640xf32> -> vector<16x640xf32>
    %18 = vector.extract_strided_slice %17 {offsets = [0, 0], sizes = [16, 128], strides = [1, 1]} : vector<16x640xf32> to vector<16x128xf32>
    %19 = vector.extract_strided_slice %17 {offsets = [0, 128], sizes = [16, 128], strides = [1, 1]} : vector<16x640xf32> to vector<16x128xf32>
    %20 = vector.extract_strided_slice %17 {offsets = [0, 256], sizes = [16, 128], strides = [1, 1]} : vector<16x640xf32> to vector<16x128xf32>
    %21 = vector.extract_strided_slice %17 {offsets = [0, 384], sizes = [16, 128], strides = [1, 1]} : vector<16x640xf32> to vector<16x128xf32>
    %22 = vector.extract_strided_slice %17 {offsets = [0, 512], sizes = [16, 128], strides = [1, 1]} : vector<16x640xf32> to vector<16x128xf32>
    %23 = arith.mulf %18, %18 : vector<16x128xf32>
    %24 = arith.subf %20, %23 : vector<16x128xf32>
    %25 = arith.mulf %19, %19 : vector<16x128xf32>
    %26 = arith.subf %21, %25 : vector<16x128xf32>
    %27 = arith.mulf %18, %19 : vector<16x128xf32>
    %28 = arith.subf %22, %27 : vector<16x128xf32>
    %cst_16 = arith.constant 2.000000e+00 : f32
    %29 = vector.broadcast %cst_16 : f32 to vector<16x128xf32>
    %30 = arith.mulf %29, %18 : vector<16x128xf32>
    %31 = arith.mulf %30, %19 : vector<16x128xf32>
    %cst_17 = arith.constant 9.99999974E-5 : f32
    %32 = vector.broadcast %cst_17 : f32 to vector<16x128xf32>
    %33 = arith.addf %31, %32 : vector<16x128xf32>
    %cst_18 = arith.constant 2.000000e+00 : f32
    %34 = vector.broadcast %cst_18 : f32 to vector<16x128xf32>
    %35 = arith.mulf %34, %28 : vector<16x128xf32>
    %cst_19 = arith.constant 8.99999984E-4 : f32
    %36 = vector.broadcast %cst_19 : f32 to vector<16x128xf32>
    %37 = arith.addf %35, %36 : vector<16x128xf32>
    %38 = arith.mulf %33, %37 : vector<16x128xf32>
    %39 = arith.mulf %18, %18 : vector<16x128xf32>
    %40 = arith.mulf %19, %19 : vector<16x128xf32>
    %41 = arith.addf %39, %40 : vector<16x128xf32>
    %cst_20 = arith.constant 9.99999974E-5 : f32
    %42 = vector.broadcast %cst_20 : f32 to vector<16x128xf32>
    %43 = arith.addf %41, %42 : vector<16x128xf32>
    %44 = arith.addf %24, %26 : vector<16x128xf32>
    %cst_21 = arith.constant 8.99999984E-4 : f32
    %45 = vector.broadcast %cst_21 : f32 to vector<16x128xf32>
    %46 = arith.addf %44, %45 : vector<16x128xf32>
    %47 = arith.mulf %43, %46 : vector<16x128xf32>
    %48 = tpu.reciprocal %47 {approx = true} : vector<16x128xf32> -> vector<16x128xf32>
    %49 = arith.mulf %47, %48 : vector<16x128xf32>
    %cst_22 = arith.constant 2.000000e+00 : f32
    %50 = vector.broadcast %cst_22 : f32 to vector<16x128xf32>
    %51 = arith.subf %50, %49 : vector<16x128xf32>
    %52 = arith.mulf %48, %51 : vector<16x128xf32>
    %53 = arith.mulf %38, %52 : vector<16x128xf32>
    %54 = arith.subf %5, %7 : vector<16x128xf32>
    %55 = math.absf %54 : vector<16x128xf32>
    %56 = vector.shape_cast %55 : vector<16x128xf32> to vector<2x8x128xf32>
    %cst_23 = arith.constant dense<0.000000e+00> : vector<8x128xf32>
    %57 = vector.multi_reduction <add>, %56, %cst_23 [0] : vector<2x8x128xf32> to vector<8x128xf32>
    %58 = arith.addf %2, %57 : vector<8x128xf32>
    %59 = vector.shape_cast %53 : vector<16x128xf32> to vector<2x8x128xf32>
    %cst_24 = arith.constant dense<0.000000e+00> : vector<8x128xf32>
    %60 = vector.multi_reduction <add>, %59, %cst_24 [0] : vector<2x8x128xf32> to vector<8x128xf32>
    %61 = arith.addf %3, %60 : vector<8x128xf32>
    %c0_25 = arith.constant 0 : index
    %c0_26 = arith.constant 0 : index
    %c0_27 = arith.constant 0 : index
    %62 = vector.load %arg5[%c0_25, %c0_26, %c0_27] : memref<1x8x128xf32, #tpu.memory_space<vmem>>, vector<1x8x128xf32>
    %63 = vector.shape_cast %62 : vector<1x8x128xf32> to vector<8x128xf32>
    %64 = vector.shape_cast %58 : vector<8x128xf32> to vector<1x8x128xf32>
    tpu.vector_store %arg5[%c0_25, %c0_26, %c0_27], %64 {strides = array<i32>} : memref<1x8x128xf32, #tpu.memory_space<vmem>>, vector<1x8x128xf32>,
    %c0_28 = arith.constant 0 : index
    %c0_29 = arith.constant 0 : index
    %c0_30 = arith.constant 0 : index
    %65 = vector.load %arg6[%c0_28, %c0_29, %c0_30] : memref<1x8x128xf32, #tpu.memory_space<vmem>>, vector<1x8x128xf32>
    %66 = vector.shape_cast %65 : vector<1x8x128xf32> to vector<8x128xf32>
    %67 = vector.shape_cast %61 : vector<8x128xf32> to vector<1x8x128xf32>
    tpu.vector_store %arg6[%c0_28, %c0_29, %c0_30], %67 {strides = array<i32>} : memref<1x8x128xf32, #tpu.memory_space<vmem>>, vector<1x8x128xf32>,
    return
  }
  func.func @transform_0(%arg0: i32) -> (i32, i32, i32) {
    %c0_i32 = arith.constant 0 : i32
    %c0_i32_0 = arith.constant 0 : i32
    %c0_i32_1 = arith.constant 0 : i32
    return %arg0, %c0_i32, %c0_i32_0 : i32, i32, i32
  }
  func.func @transform_1(%arg0: i32) -> (i32, i32, i32) {
    %c0_i32 = arith.constant 0 : i32
    %c0_i32_0 = arith.constant 0 : i32
    %c0_i32_1 = arith.constant 0 : i32
    return %arg0, %c0_i32, %c0_i32_0 : i32, i32, i32
  }
  func.func @transform_2(%arg0: i32) -> (i32, i32) {
    %c0_i32 = arith.constant 0 : i32
    %c0_i32_0 = arith.constant 0 : i32
    %c0_i32_1 = arith.constant 0 : i32
    return %c0_i32, %c0_i32_0 : i32, i32
  }
  func.func @transform_3(%arg0: i32) -> (i32, i32) {
    %c0_i32 = arith.constant 0 : i32
    %c0_i32_0 = arith.constant 0 : i32
    %c0_i32_1 = arith.constant 0 : i32
    return %c0_i32, %c0_i32_0 : i32, i32
  }
  func.func @transform_4(%arg0: i32) -> (i32, i32, i32) {
    %c0_i32 = arith.constant 0 : i32
    %c0_i32_0 = arith.constant 0 : i32
    %c0_i32_1 = arith.constant 0 : i32
    return %arg0, %c0_i32, %c0_i32_0 : i32, i32, i32
  }
  func.func @transform_5(%arg0: i32) -> (i32, i32, i32) {
    %c0_i32 = arith.constant 0 : i32
    %c0_i32_0 = arith.constant 0 : i32
    %c0_i32_1 = arith.constant 0 : i32
    return %arg0, %c0_i32, %c0_i32_0 : i32, i32, i32
  }
}

module attributes {stable_mosaic.version = 11 : i64} {
  func.func @_l1_ssim_kernel(%arg0: i32, %arg1: memref<1x16x128xf32, #tpu.memory_space<vmem>>, %arg2: memref<1x16x128xf32, #tpu.memory_space<vmem>>, %arg3: memref<16x16xf32, #tpu.memory_space<vmem>>, %arg4: memref<128x128xf32, #tpu.memory_space<vmem>>, %arg5: memref<1x8x128xf32, #tpu.memory_space<vmem>>, %arg6: memref<1x8x128xf32, #tpu.memory_space<vmem>>) attributes {dimension_semantics = [#tpu.dimension_semantics<parallel>], iteration_bounds = array<i64: 1>, scalar_prefetch = 0 : i64, scratch_operands = 0 : i64, tpu.core_type = #tpu.core_type<tc>, window_params = [{transform_indices = @transform_0, window_bounds = array<i64: 1, 16, 128>}, {transform_indices = @transform_1, window_bounds = array<i64: 1, 16, 128>}, {pipeline_mode = #tpu.pipeline_mode<synchronous>, transform_indices = @transform_2, window_bounds = array<i64: 16, 16>}, {pipeline_mode = #tpu.pipeline_mode<synchronous>, transform_indices = @transform_3, window_bounds = array<i64: 128, 128>}, {transform_indices = @transform_4, window_bounds = array<i64: 1, 8, 128>}, {transform_indices = @transform_5, window_bounds = array<i64: 1, 8, 128>}]} {
    %c0 = arith.constant 0 : index
    %c0_0 = arith.constant 0 : index
    %0 = vector.load %arg3[%c0, %c0_0] : memref<16x16xf32, #tpu.memory_space<vmem>>, vector<16x16xf32>
    %c0_1 = arith.constant 0 : index
    %c0_2 = arith.constant 0 : index
    %1 = vector.load %arg4[%c0_1, %c0_2] : memref<128x128xf32, #tpu.memory_space<vmem>>, vector<128x128xf32>
    %cst = arith.constant 0.000000e+00 : f32
    %2 = vector.broadcast %cst : f32 to vector<8x128xf32>
    %cst_3 = arith.constant 0.000000e+00 : f32
    %3 = vector.broadcast %cst_3 : f32 to vector<8x128xf32>
    %c0_4 = arith.constant 0 : index
    %c0_5 = arith.constant 0 : index
    %c0_6 = arith.constant 0 : index
    %4 = vector.load %arg1[%c0_4, %c0_5, %c0_6] : memref<1x16x128xf32, #tpu.memory_space<vmem>>, vector<1x16x128xf32>
    %5 = vector.shape_cast %4 : vector<1x16x128xf32> to vector<16x128xf32>
    %c0_7 = arith.constant 0 : index
    %c0_8 = arith.constant 0 : index
    %c0_9 = arith.constant 0 : index
    %6 = vector.load %arg2[%c0_7, %c0_8, %c0_9] : memref<1x16x128xf32, #tpu.memory_space<vmem>>, vector<1x16x128xf32>
    %7 = vector.shape_cast %6 : vector<1x16x128xf32> to vector<16x128xf32>
    %cst_10 = arith.constant dense<0.000000e+00> : vector<16x128xf32>
    %8 = tpu.matmul %5, %1, %cst_10 {dimension_numbers = #tpu.dot_dimension_numbers<[1], [0], [0], [1], [0, 0, 1, 1], [], []>} : vector<16x128xf32>, vector<128x128xf32>, vector<16x128xf32> -> vector<16x128xf32>
    %cst_11 = arith.constant dense<0.000000e+00> : vector<16x128xf32>
    %9 = tpu.matmul %7, %1, %cst_11 {dimension_numbers = #tpu.dot_dimension_numbers<[1], [0], [0], [1], [0, 0, 1, 1], [], []>} : vector<16x128xf32>, vector<128x128xf32>, vector<16x128xf32> -> vector<16x128xf32>
    %10 = arith.mulf %5, %5 : vector<16x128xf32>
    %cst_12 = arith.constant dense<0.000000e+00> : vector<16x128xf32>
    %11 = tpu.matmul %10, %1, %cst_12 {dimension_numbers = #tpu.dot_dimension_numbers<[1], [0], [0], [1], [0, 0, 1, 1], [], []>} : vector<16x128xf32>, vector<128x128xf32>, vector<16x128xf32> -> vector<16x128xf32>
    %12 = arith.mulf %7, %7 : vector<16x128xf32>
    %cst_13 = arith.constant dense<0.000000e+00> : vector<16x128xf32>
    %13 = tpu.matmul %12, %1, %cst_13 {dimension_numbers = #tpu.dot_dimension_numbers<[1], [0], [0], [1], [0, 0, 1, 1], [], []>} : vector<16x128xf32>, vector<128x128xf32>, vector<16x128xf32> -> vector<16x128xf32>
    %14 = arith.mulf %5, %7 : vector<16x128xf32>
    %cst_14 = arith.constant dense<0.000000e+00> : vector<16x128xf32>
    %15 = tpu.matmul %14, %1, %cst_14 {dimension_numbers = #tpu.dot_dimension_numbers<[1], [0], [0], [1], [0, 0, 1, 1], [], []>} : vector<16x128xf32>, vector<128x128xf32>, vector<16x128xf32> -> vector<16x128xf32>
    %16 = tpu.concatenate %8, %9, %11, %13, %15 in 1 : vector<16x128xf32>, vector<16x128xf32>, vector<16x128xf32>, vector<16x128xf32>, vector<16x128xf32> -> vector<16x640xf32>
    %cst_15 = arith.constant dense<0.000000e+00> : vector<16x640xf32>
    %17 = tpu.matmul %0, %16, %cst_15 {dimension_numbers = #tpu.dot_dimension_numbers<[1], [0], [0], [1], [0, 0, 1, 1], [], []>} : vector<16x16xf32>, vector<16x640xf32>, vector<16x640xf32> -> vector<16x640xf32>
    %18 = vector.extract_strided_slice %17 {offsets = [0, 0], sizes = [16, 128], strides = [1, 1]} : vector<16x640xf32> to vector<16x128xf32>
    %19 = vector.extract_strided_slice %17 {offsets = [0, 128], sizes = [16, 128], strides = [1, 1]} : vector<16x640xf32> to vector<16x128xf32>
    %20 = vector.extract_strided_slice %17 {offsets = [0, 256], sizes = [16, 128], strides = [1, 1]} : vector<16x640xf32> to vector<16x128xf32>
    %21 = vector.extract_strided_slice %17 {offsets = [0, 384], sizes = [16, 128], strides = [1, 1]} : vector<16x640xf32> to vector<16x128xf32>
    %22 = vector.extract_strided_slice %17 {offsets = [0, 512], sizes = [16, 128], strides = [1, 1]} : vector<16x640xf32> to vector<16x128xf32>
    %23 = arith.mulf %18, %18 : vector<16x128xf32>
    %24 = arith.subf %20, %23 : vector<16x128xf32>
    %25 = arith.mulf %19, %19 : vector<16x128xf32>
    %26 = arith.subf %21, %25 : vector<16x128xf32>
    %27 = arith.mulf %18, %19 : vector<16x128xf32>
    %28 = arith.subf %22, %27 : vector<16x128xf32>
    %cst_16 = arith.constant 2.000000e+00 : f32
    %29 = vector.broadcast %cst_16 : f32 to vector<16x128xf32>
    %30 = arith.mulf %29, %18 : vector<16x128xf32>
    %31 = arith.mulf %30, %19 : vector<16x128xf32>
    %cst_17 = arith.constant 9.99999974E-5 : f32
    %32 = vector.broadcast %cst_17 : f32 to vector<16x128xf32>
    %33 = arith.addf %31, %32 : vector<16x128xf32>
    %cst_18 = arith.constant 2.000000e+00 : f32
    %34 = vector.broadcast %cst_18 : f32 to vector<16x128xf32>
    %35 = arith.mulf %34, %28 : vector<16x128xf32>
    %cst_19 = arith.constant 8.99999984E-4 : f32
    %36 = vector.broadcast %cst_19 : f32 to vector<16x128xf32>
    %37 = arith.addf %35, %36 : vector<16x128xf32>
    %38 = arith.mulf %33, %37 : vector<16x128xf32>
    %39 = arith.mulf %18, %18 : vector<16x128xf32>
    %40 = arith.mulf %19, %19 : vector<16x128xf32>
    %41 = arith.addf %39, %40 : vector<16x128xf32>
    %cst_20 = arith.constant 9.99999974E-5 : f32
    %42 = vector.broadcast %cst_20 : f32 to vector<16x128xf32>
    %43 = arith.addf %41, %42 : vector<16x128xf32>
    %44 = arith.addf %24, %26 : vector<16x128xf32>
    %cst_21 = arith.constant 8.99999984E-4 : f32
    %45 = vector.broadcast %cst_21 : f32 to vector<16x128xf32>
    %46 = arith.addf %44, %45 : vector<16x128xf32>
    %47 = arith.mulf %43, %46 : vector<16x128xf32>
    %48 = tpu.reciprocal %47 {approx = true} : vector<16x128xf32> -> vector<16x128xf32>
    %49 = arith.mulf %47, %48 : vector<16x128xf32>
    %cst_22 = arith.constant 2.000000e+00 : f32
    %50 = vector.broadcast %cst_22 : f32 to vector<16x128xf32>
    %51 = arith.subf %50, %49 : vector<16x128xf32>
    %52 = arith.mulf %48, %51 : vector<16x128xf32>
    %53 = arith.mulf %38, %52 : vector<16x128xf32>
    %54 = arith.subf %5, %7 : vector<16x128xf32>
    %55 = math.absf %54 : vector<16x128xf32>
    %56 = vector.shape_cast %55 : vector<16x128xf32> to vector<2x8x128xf32>
    %cst_23 = arith.constant dense<0.000000e+00> : vector<8x128xf32>
    %57 = vector.multi_reduction <add>, %56, %cst_23 [0] : vector<2x8x128xf32> to vector<8x128xf32>
    %58 = arith.addf %2, %57 : vector<8x128xf32>
    %59 = vector.shape_cast %53 : vector<16x128xf32> to vector<2x8x128xf32>
    %cst_24 = arith.constant dense<0.000000e+00> : vector<8x128xf32>
    %60 = vector.multi_reduction <add>, %59, %cst_24 [0] : vector<2x8x128xf32> to vector<8x128xf32>
    %61 = arith.addf %3, %60 : vector<8x128xf32>
    %c0_25 = arith.constant 0 : index
    %c0_26 = arith.constant 0 : index
    %c0_27 = arith.constant 0 : index
    %62 = vector.load %arg5[%c0_25, %c0_26, %c0_27] : memref<1x8x128xf32, #tpu.memory_space<vmem>>, vector<1x8x128xf32>
    %63 = vector.shape_cast %62 : vector<1x8x128xf32> to vector<8x128xf32>
    %64 = vector.shape_cast %58 : vector<8x128xf32> to vector<1x8x128xf32>
    tpu.vector_store %arg5[%c0_25, %c0_26, %c0_27], %64 {strides = array<i32>} : memref<1x8x128xf32, #tpu.memory_space<vmem>>, vector<1x8x128xf32>,
    %c0_28 = arith.constant 0 : index
    %c0_29 = arith.constant 0 : index
    %c0_30 = arith.constant 0 : index
    %65 = vector.load %arg6[%c0_28, %c0_29, %c0_30] : memref<1x8x128xf32, #tpu.memory_space<vmem>>, vector<1x8x128xf32>
    %66 = vector.shape_cast %65 : vector<1x8x128xf32> to vector<8x128xf32>
    %67 = vector.shape_cast %61 : vector<8x128xf32> to vector<1x8x128xf32>
    tpu.vector_store %arg6[%c0_28, %c0_29, %c0_30], %67 {strides = array<i32>} : memref<1x8x128xf32, #tpu.memory_space<vmem>>, vector<1x8x128xf32>,
    return
  }
  func.func @transform_0(%arg0: i32) -> (i32, i32, i32) {
    %c0_i32 = arith.constant 0 : i32
    %c0_i32_0 = arith.constant 0 : i32
    %c0_i32_1 = arith.constant 0 : i32
    return %arg0, %c0_i32, %c0_i32_0 : i32, i32, i32
  }
  func.func @transform_1(%arg0: i32) -> (i32, i32, i32) {
    %c0_i32 = arith.constant 0 : i32
    %c0_i32_0 = arith.constant 0 : i32
    %c0_i32_1 = arith.constant 0 : i32
    return %arg0, %c0_i32, %c0_i32_0 : i32, i32, i32
  }
  func.func @transform_2(%arg0: i32) -> (i32, i32) {
    %c0_i32 = arith.constant 0 : i32
    %c0_i32_0 = arith.constant 0 : i32
    %c0_i32_1 = arith.constant 0 : i32
    return %c0_i32, %c0_i32_0 : i32, i32
  }
  func.func @transform_3(%arg0: i32) -> (i32, i32) {
    %c0_i32 = arith.constant 0 : i32
    %c0_i32_0 = arith.constant 0 : i32
    %c0_i32_1 = arith.constant 0 : i32
    return %c0_i32, %c0_i32_0 : i32, i32
  }
  func.func @transform_4(%arg0: i32) -> (i32, i32, i32) {
    %c0_i32 = arith.constant 0 : i32
    %c0_i32_0 = arith.constant 0 : i32
    %c0_i32_1 = arith.constant 0 : i32
    return %arg0, %c0_i32, %c0_i32_0 : i32, i32, i32
  }
  func.func @transform_5(%arg0: i32) -> (i32, i32, i32) {
    %c0_i32 = arith.constant 0 : i32
    %c0_i32_0 = arith.constant 0 : i32
    %c0_i32_1 = arith.constant 0 : i32
    return %arg0, %c0_i32, %c0_i32_0 : i32, i32, i32
  }
}

</mosaic_0001>

<bundles_post_ra>
// kernel: tpu_custom_call.1
= control target key start
LH: loop header
LB: loop body
LE: loop exit
PB: predicated region body
PF: predicated region fallthrough
CT: control target
= control target key end

     0   :  { %11 = vsyncpa [#allocation3], 0  ;;  %s1676_s0 = inlined_call_operand.hbm [shape: f32[1,16,128], index: 0, kind: input, shape index: {}]   ;;  %s1677_s1 = inlined_call_operand.hbm [shape: f32[1,16,128], index: 1, kind: input, shape index: {}]   ;;  %s1678_s2 = inlined_call_operand.hbm [shape: f32[16,16], index: 2, kind: input, shape index: {}]   ;;  %s1679_s3 = inlined_call_operand.hbm [shape: f32[128,128], index: 3, kind: input, shape index: {}]   ;;  %s1680_s4 = inlined_call_operand.hbm [shape: f32[1,8,128], index: 4, kind: output, shape index: {0}]   ;;  %s1681_s5 = inlined_call_operand.hbm [shape: f32[1,8,128], index: 5, kind: output, shape index: {1}]  }
   0x1   :  { %12 = vsyncpa [#allocation6], 0 }
   0x2   :  { %13 = vsyncpa [#allocation9], 0 }
   0x3   :  { %14 = vsyncpa [#allocation4], 0 }
   0x4   :  { %15 = vsyncpa [#allocation12], 0  ;;  %s1409_s18 = smov [#allocation5]   ;;  %s1410_s20 = smov [#allocation2]  }
   0x5   :  { %s33_s19 = sshll.u32 %s1409_s18, 4  ;;  %s21_s21 = sshll.u32 %s1410_s20, 4  ;;  %s34_s19 = int_to_ptr.vmem [resolvable:$true] %s33_s19  ;;  %s1448_s21 = int_to_ptr.vmem [resolvable:$true] %s21_s21 }
   0x6   :  { %s1267_s24 = scalar_lea.hbm %s1677_s1, 256 }
   0x7   :  { %p1268_p0 = scmp.ne.s32.totalorder %s1677_s1, %s1267_s24  ;;  %p1271_p1 = scmp.lt.u32.totalorder %s1267_s24, %s1677_s1 }
   0x9   :  { %p1273_p2 = pnand %p1271_p1, %p1268_p0 }
   0xb   :  { %1276 = shalt.err (!%p1273_p2)
}
   0xc   :  { %s1277_s29 = scalar_lea.vmem %s34_s19, 256  ;;  %p1282_p4 = scmp.lt.s32.totalorder %s34_s19, %s34_s19 }
   0xd   :  { %p1278_p3 = scmp.ne.s32.totalorder %s34_s19, %s1277_s29  ;;  %p1283_p5 = scmp.lt.s32.totalorder %s1277_s29, %s1277_s29 }
   0xf   :  { %p1284_p6 = por %p1283_p5, %p1282_p4 }
  0x11   :  { %p1285_p7 = pnand %p1284_p6, %p1278_p3 }
  0x13   :  { %1288 = shalt.err (!%p1285_p7)
}
  0x14   :  { %s1411_s30 = smov 128   ;;  %s1412_s6 = smov 8  }
  0x15   :  { %39 = dma.hbm_to_vmem [thread:$0]  %s1677_s1, 256, %s34_s19, [#allocation6], %s1411_s30, %s1411_s30, %s1412_s6  }
  0x16   :  { %s1289_s11 = scalar_lea.hbm %s1676_s0, 256 }
  0x17   :  { %p1290_p8 = scmp.ne.s32.totalorder %s1676_s0, %s1289_s11  ;;  %p1293_p9 = scmp.lt.u32.totalorder %s1289_s11, %s1676_s0 }
  0x19   :  { %p1295_p10 = pnand %p1293_p9, %p1290_p8 }
  0x1b   :  { %1298 = shalt.err (!%p1295_p10)
}
  0x1c   :  { %s1299_s16 = scalar_lea.vmem %s1448_s21, 256  ;;  %p1304_p12 = scmp.lt.s32.totalorder %s1448_s21, %s1448_s21 }
  0x1d   :  { %p1300_p11 = scmp.ne.s32.totalorder %s1448_s21, %s1299_s16  ;;  %p1305_p13 = scmp.lt.s32.totalorder %s1299_s16, %s1299_s16 }
  0x1f   :  { %p1306_p0 = por %p1305_p13, %p1304_p12 }
  0x21   :  { %p1307_p1 = pnand %p1306_p0, %p1300_p11 }
  0x23   :  { %1310 = shalt.err (!%p1307_p1)
}
  0x24   :  { %27 = dma.hbm_to_vmem [thread:$0]  %s1676_s0, 256, %s1448_s21, [#allocation3], %s1411_s30, %s1411_s30, %s1412_s6  }
  0x25   :  { %s1413_s18 = smov [#allocation7]   ;;  %s1414_s20 = smov [#allocation8]  }
  0x26   :  { %s45_s19 = sshll.u32 %s1413_s18, 4  ;;  %s57_s22 = sshll.u32 %s1414_s20, 4  ;;  %s46_s19 = int_to_ptr.vmem [resolvable:$true] %s45_s19  ;;  %s1485_s22 = int_to_ptr.vmem [resolvable:$true] %s57_s22 }
  0x27   :  { %s1311_s25 = scalar_lea.hbm %s1678_s2, 256 }
  0x28   :  { %p1312_p2 = scmp.ne.s32.totalorder %s1678_s2, %s1311_s25  ;;  %p1315_p3 = scmp.lt.u32.totalorder %s1311_s25, %s1678_s2 }
  0x2a   :  { %p1317_p4 = pnand %p1315_p3, %p1312_p2 }
  0x2c   :  { %1320 = shalt.err (!%p1317_p4)
}
  0x2d   :  { %s1321_s0 = scalar_lea.vmem %s46_s19, 256  ;;  %p1326_p6 = scmp.lt.s32.totalorder %s46_s19, %s46_s19 }
  0x2e   :  { %p1322_p5 = scmp.ne.s32.totalorder %s46_s19, %s1321_s0  ;;  %p1327_p7 = scmp.lt.s32.totalorder %s1321_s0, %s1321_s0 }
  0x30   :  { %p1328_p8 = por %p1327_p7, %p1326_p6 }
  0x32   :  { %p1329_p9 = pnand %p1328_p8, %p1322_p5 }
  0x34   :  { %1332 = shalt.err (!%p1329_p9)
}
  0x35   :  { %51 = dma.hbm_to_vmem [thread:$0]  %s1678_s2, 256, %s46_s19, [#allocation6], %s1411_s30, %s1411_s30, %s1412_s6  }
  0x36   :  { %s1333_s10 = scalar_lea.hbm %s1679_s3, 2048 }
  0x37   :  { %p1334_p10 = scmp.ne.s32.totalorder %s1679_s3, %s1333_s10  ;;  %p1337_p11 = scmp.lt.u32.totalorder %s1333_s10, %s1679_s3 }
  0x39   :  { %p1339_p12 = pnand %p1337_p11, %p1334_p10 }
  0x3b   :  { %1342 = shalt.err (!%p1339_p12)
}
  0x3c   :  { %s1343_s15 = scalar_lea.vmem %s1485_s22, 2048  ;;  %p1348_p0 = scmp.lt.s32.totalorder %s1485_s22, %s1485_s22 }
  0x3d   :  { %p1344_p13 = scmp.ne.s32.totalorder %s1485_s22, %s1343_s15  ;;  %p1349_p1 = scmp.lt.s32.totalorder %s1343_s15, %s1343_s15 }
  0x3f   :  { %p1350_p2 = por %p1349_p1, %p1348_p0 }
  0x41   :  { %p1351_p3 = pnand %p1350_p2, %p1344_p13 }
  0x43   :  { %1354 = shalt.err (!%p1351_p3)
}
  0x44   :  { %63 = dma.hbm_to_vmem [thread:$0]  %s1679_s3, 2048, %s1485_s22, [#allocation9], %s1411_s30, %s1411_s30, %s1412_s6  }
  0x45   :  { %1399 = dma.done.wait [#allocation3], 256  }
  0x46   :  { %1400 = vsyncadd [#allocation3], 4294967040 }
  0x47   :  { %1401 = dma.done.wait [#allocation6], 512  }
  0x48   :  { %1402 = vsyncadd [#allocation6], 4294966784 }
  0x49   :  { %1403 = dma.done.wait [#allocation9], 2048  }
  0x4a   :  { %1404 = vsyncadd [#allocation9], 4294965248  ;;  %v78_v0 = vld [vmem:[#allocation8] sm:$0xff]  ;;  %v79_v1 = vld [vmem:[#allocation8 + $0x8] sm:$0xff]  ;;  %v1415_v34 = vmov 0.0   ;;  %vm479_vm0 = vcmask 130048  }
  0x4b   :  { %v80_v2 = vld [vmem:[#allocation8 + $0x10] sm:$0xff]  ;;  %v1522_v3 = vpack.c.bf16 %v79_v1, %v78_v0  ;;  %v81_v4 = vld [vmem:[#allocation8 + $0x18] sm:$0xff]  ;;  %v82_v6 = vld [vmem:[#allocation8 + $0x20] sm:$0xff]  ;;  %s1416_s3 = smov [#allocation10]  }
  0x4c   :  { %v1524_v5 = vpack.c.bf16 %v81_v4, %v80_v2  ;;  %v83_v7 = vld [vmem:[#allocation8 + $0x28] sm:$0xff]  ;;  %v1534_v9 = vld [vmem:[#allocation2] sm:$0xff]  ;;  %v1536_v10 = vld [vmem:[#allocation5] sm:$0xff]  ;;  %s775_s30 = sshll.u32 %s1416_s3, 4  ;;  %s776_s30 = int_to_ptr.vmem [resolvable:$true] %s775_s30 }
  0x4d   :  { %1083 = vmatprep.subr.bf16.mxu0 %v1522_v3  ;;  %1115 = vmatprep.subr.bf16.mxu1 %v1522_v3  ;;  %v1532_v8 = vpack.c.bf16 %v83_v7, %v82_v6  ;;  %v84_v11 = vld [vmem:[#allocation8 + $0x30] sm:$0xff]  ;;  %v85_v12 = vld [vmem:[#allocation8 + $0x38] sm:$0xff]  ;;  %v86_v14 = vld [vmem:[#allocation8 + $0x40] sm:$0xff]  ;;  %v248_v28 = vmul.f32 %v1534_v9, %v1534_v9  ;;  %v325_v29 = vmul.f32 %v1536_v10, %v1536_v10  ;;  %s1355_s6 = scalar_lea.vmem %s776_s30, 128  ;;  %p1360_p5 = scmp.lt.s32.totalorder %s776_s30, %s776_s30 }
  0x4e   :  { %1085 = vmatpush3.bf16.msra.mxu0 %v1522_v3  ;;  %1117 = vmatpush3.bf16.msra.mxu1 %v1522_v3  ;;  %v1544_v13 = vpack.c.bf16 %v85_v12, %v84_v11  ;;  %v87_v15 = vld [vmem:[#allocation8 + $0x48] sm:$0xff]  ;;  %v88_v17 = vld [vmem:[#allocation8 + $0x50] sm:$0xff]  ;;  %v89_v18 = vld [vmem:[#allocation8 + $0x58] sm:$0xff]  ;;  %v402_v32 = vmul.f32 %v1536_v10, %v1534_v9  ;;  %v759_v52 = vsub.f32 %v1534_v9, %v1536_v10  ;;  %p1356_p4 = scmp.ne.s32.totalorder %s776_s30, %s1355_s6  ;;  %p1361_p6 = scmp.lt.s32.totalorder %s1355_s6, %s1355_s6 }
  0x4f   :  { %1087 = vmatprep.subr.bf16.mxu0 %v1524_v5  ;;  %1119 = vmatprep.subr.bf16.mxu1 %v1524_v5  ;;  %v1550_v16 = vpack.c.bf16 %v87_v15, %v86_v14  ;;  %v1556_v19 = vpack.c.bf16 %v89_v18, %v88_v17  ;;  %v90_v20 = vld [vmem:[#allocation8 + $0x60] sm:$0xff]  ;;  %v91_v21 = vld [vmem:[#allocation8 + $0x68] sm:$0xff]  ;;  %v92_v23 = vld [vmem:[#allocation8 + $0x70] sm:$0xff] }
  0x50   :  { %932 = vmatprep.mubr.f32.mxu0 %v1534_v9  ;;  %967 = vmatprep.mubr.f32.mxu1 %v1536_v10  ;;  %v1562_v22 = vpack.c.bf16 %v91_v21, %v90_v20  ;;  %v93_v24 = vld [vmem:[#allocation8 + $0x78] sm:$0xff]  ;;  %v1578_v27 = vld [vmem:[#allocation5 + $0x8] sm:$0xff]  ;;  %v76_v41 = vld [vmem:[#allocation7] sm:$0xff]  ;;  %v761_v54 = vand.u32 2147483647, %v759_v52  ;;  %p1362_p7 = por %p1361_p6, %p1360_p5 }
  0x51   :  { %v1568_v25 = vpack.c.bf16 %v93_v24, %v92_v23  ;;  %v1576_v26 = vld [vmem:[#allocation2 + $0x8] sm:$0xff]  ;;  %v326_v31 = vmul.f32 %v1578_v27, %v1578_v27 }
  0x52   :  { %1089 = vmatpush3.bf16.msra.mxu0 %v1524_v5  ;;  %1121 = vmatpush3.bf16.msra.mxu1 %v1524_v5  ;;  %v249_v30 = vmul.f32 %v1576_v26, %v1576_v26  ;;  %v403_v33 = vmul.f32 %v1578_v27, %v1576_v26  ;;  %v77_v42 = vld [vmem:[#allocation7 + $0x8] sm:$0xff]  ;;  %v760_v53 = vsub.f32 %v1576_v26, %v1578_v27  ;;  %p1363_p8 = pnand %p1362_p7, %p1356_p4 }
  0x53   :  { %1091 = vmatprep.subr.bf16.mxu0 %v1532_v8  ;;  %1123 = vmatprep.subr.bf16.mxu1 %v1532_v8 }
  0x54   :  { %v762_v55 = vand.u32 2147483647, %v760_v53 }
  0x56   :  { %1093 = vmatpush3.bf16.msra.mxu0 %v1532_v8  ;;  %1125 = vmatpush3.bf16.msra.mxu1 %v1532_v8  ;;  %v763_v56 = vadd.f32 %v762_v55, %v761_v54 }
  0x57   :  { %1095 = vmatprep.subr.bf16.mxu0 %v1544_v13  ;;  %1127 = vmatprep.subr.bf16.mxu1 %v1544_v13 }
  0x58   :  { %767 = vst [vmem:[#allocation10] sm:$0xff] %v763_v56 }
  0x5a   :  { %1097 = vmatpush3.bf16.msra.mxu0 %v1544_v13  ;;  %1129 = vmatpush3.bf16.msra.mxu1 %v1544_v13 }
  0x5b   :  { %1099 = vmatprep.subr.bf16.mxu0 %v1550_v16  ;;  %1131 = vmatprep.subr.bf16.mxu1 %v1550_v16 }
  0x5e   :  { %1101 = vmatpush3.bf16.msra.mxu0 %v1550_v16  ;;  %1133 = vmatpush3.bf16.msra.mxu1 %v1550_v16 }
  0x5f   :  { %1103 = vmatprep.subr.bf16.mxu0 %v1556_v19  ;;  %1135 = vmatprep.subr.bf16.mxu1 %v1556_v19 }
  0x62   :  { %1105 = vmatpush3.bf16.msra.mxu0 %v1556_v19  ;;  %1137 = vmatpush3.bf16.msra.mxu1 %v1556_v19 }
  0x63   :  { %1107 = vmatprep.subr.bf16.mxu0 %v1562_v22  ;;  %1139 = vmatprep.subr.bf16.mxu1 %v1562_v22 }
  0x66   :  { %1109 = vmatpush3.bf16.msra.mxu0 %v1562_v22  ;;  %1141 = vmatpush3.bf16.msra.mxu1 %v1562_v22 }
  0x67   :  { %1111 = vmatprep.subr.bf16.mxu0 %v1568_v25  ;;  %1143 = vmatprep.subr.bf16.mxu1 %v1568_v25 }
  0x6a   :  { %1113 = vmatpush3.bf16.msra.mxu0 %v1568_v25  ;;  %1145 = vmatpush3.bf16.msra.mxu1 %v1568_v25 }
  0x6b   :  { %1147 = vmatprep.subr.bf16.mxu0 %v1522_v3  ;;  %1179 = vmatprep.subr.bf16.mxu1 %v1522_v3 }
  0x6d   :  { %933 = vmatmul.mubr.f32.vlgmr.msra.gmra.mrb[0].mxu0 %v1576_v26  ;;  %968 = vmatmul.mubr.f32.vlgmr.msra.gmra.mrb[0].mxu1 %v1578_v27 }
  0x6e   :  { %1149 = vmatpush3.bf16.msra.mxu0 %v1522_v3  ;;  %1181 = vmatpush3.bf16.msra.mxu1 %v1522_v3 }
  0x6f   :  { %1151 = vmatprep.subr.bf16.mxu0 %v1524_v5  ;;  %1183 = vmatprep.subr.bf16.mxu1 %v1524_v5 }
  0x70   :  { %1002 = vmatprep.mubr.f32.mxu0 %v248_v28  ;;  %1037 = vmatprep.mubr.f32.mxu1 %v325_v29 }
  0x72   :  { %1153 = vmatpush3.bf16.msra.mxu0 %v1524_v5  ;;  %1185 = vmatpush3.bf16.msra.mxu1 %v1524_v5 }
  0x73   :  { %1155 = vmatprep.subr.bf16.mxu0 %v1532_v8  ;;  %1187 = vmatprep.subr.bf16.mxu1 %v1532_v8 }
  0x76   :  { %1157 = vmatpush3.bf16.msra.mxu0 %v1532_v8  ;;  %1189 = vmatpush3.bf16.msra.mxu1 %v1532_v8 }
  0x77   :  { %1159 = vmatprep.subr.bf16.mxu0 %v1544_v13  ;;  %1191 = vmatprep.subr.bf16.mxu1 %v1544_v13 }
  0x7a   :  { %1161 = vmatpush3.bf16.msra.mxu0 %v1544_v13  ;;  %1193 = vmatpush3.bf16.msra.mxu1 %v1544_v13 }
  0x7b   :  { %1163 = vmatprep.subr.bf16.mxu0 %v1550_v16  ;;  %1195 = vmatprep.subr.bf16.mxu1 %v1550_v16 }
  0x7e   :  { %1165 = vmatpush3.bf16.msra.mxu0 %v1550_v16  ;;  %1197 = vmatpush3.bf16.msra.mxu1 %v1550_v16 }
  0x7f   :  { %1167 = vmatprep.subr.bf16.mxu0 %v1556_v19  ;;  %1199 = vmatprep.subr.bf16.mxu1 %v1556_v19 }
  0x82   :  { %1169 = vmatpush3.bf16.msra.mxu0 %v1556_v19  ;;  %1201 = vmatpush3.bf16.msra.mxu1 %v1556_v19 }
  0x83   :  { %1171 = vmatprep.subr.bf16.mxu0 %v1562_v22  ;;  %1203 = vmatprep.subr.bf16.mxu1 %v1562_v22 }
  0x86   :  { %1173 = vmatpush3.bf16.msra.mxu0 %v1562_v22  ;;  %1205 = vmatpush3.bf16.msra.mxu1 %v1562_v22 }
  0x87   :  { %1175 = vmatprep.subr.bf16.mxu0 %v1568_v25  ;;  %1207 = vmatprep.subr.bf16.mxu1 %v1568_v25 }
  0x8a   :  { %1177 = vmatpush3.bf16.msra.mxu0 %v1568_v25  ;;  %1209 = vmatpush3.bf16.msra.mxu1 %v1568_v25 }
  0x8b   :  { %1211 = vmatprep.subr.bf16.mxu0 %v1522_v3 }
  0x8d   :  { %1003 = vmatmul.mubr.f32.vlgmr.msra.gmra.mrb[2].mxu0 %v249_v30  ;;  %1038 = vmatmul.mubr.f32.vlgmr.msra.gmra.mrb[2].mxu1 %v326_v31 }
  0x8e   :  { %1213 = vmatpush3.bf16.msra.mxu0 %v1522_v3  ;;  %1072 = vmatprep.mubr.f32.mxu0 %v402_v32 }
  0x8f   :  { %1215 = vmatprep.subr.bf16.mxu0 %v1524_v5  ;;  %550 = vmatprep.mubr.f32.mxu1 %v1415_v34 }
  0x92   :  { %1217 = vmatpush3.bf16.msra.mxu0 %v1524_v5 }
  0x93   :  { %1219 = vmatprep.subr.bf16.mxu0 %v1532_v8 }
  0x96   :  { %1221 = vmatpush3.bf16.msra.mxu0 %v1532_v8 }
  0x97   :  { %1223 = vmatprep.subr.bf16.mxu0 %v1544_v13 }
  0x9a   :  { %1225 = vmatpush3.bf16.msra.mxu0 %v1544_v13 }
  0x9b   :  { %1227 = vmatprep.subr.bf16.mxu0 %v1550_v16 }
  0x9e   :  { %1229 = vmatpush3.bf16.msra.mxu0 %v1550_v16 }
  0x9f   :  { %1231 = vmatprep.subr.bf16.mxu0 %v1556_v19 }
  0xa2   :  { %1233 = vmatpush3.bf16.msra.mxu0 %v1556_v19 }
  0xa3   :  { %1235 = vmatprep.subr.bf16.mxu0 %v1562_v22 }
  0xa6   :  { %1237 = vmatpush3.bf16.msra.mxu0 %v1562_v22 }
  0xa7   :  { %1239 = vmatprep.subr.bf16.mxu0 %v1568_v25 }
  0xaa   :  { %1241 = vmatpush3.bf16.msra.mxu0 %v1568_v25 }
  0xad   :  { %1073 = vmatmul.mubr.f32.vlgmr.msra.gmra.mrb[4].mxu0 %v403_v33 }
 0x140   :  { %v934_v35 = vpop.f32.mrb[0].mxu0  ;;  %v969_v36 = vpop.f32.mrb[0].mxu1 }
 0x141   :  { %v164_v37 = vpop.f32.mrb[1].mxu0  ;;  %v239_v38 = vpop.f32.mrb[1].mxu1 }
 0x142   :  { %v1244_v39 = vpack.c.bf16 %v934_v35, %v164_v37  ;;  %v1242_v40 = vpack.c.bf16 %v969_v36, %v239_v38 }
 0x144   :  { %1243 = vmatprep.subr.bf16.mxu1 %v1242_v40 }
 0x145   :  { %1245 = vmatpush1.bf16.msra.mxu1 %v1244_v39 }
 0x148   :  { %800 = vmatmul.mubr.msk.f32.vlgmr.msra.gmra.mrb[4].mxu1 %vm479_vm0, %v76_v41 }
 0x149   :  { %556 = vmatprep.mubr.f32.mxu1 %v1415_v34 }
 0x14c   :  { %801 = vmatmul.mubr.msk.f32.gmra.mrb[6].mxu1 %vm479_vm0, %v77_v42 }
 0x14d   :  { %627 = vmatprep.mubr.f32.mxu1 %v1415_v34 }
 0x160   :  { %v1004_v43 = vpop.f32.mrb[2].mxu0  ;;  %v1039_v44 = vpop.f32.mrb[2].mxu1 }
 0x161   :  { %v316_v45 = vpop.f32.mrb[3].mxu0  ;;  %v393_v46 = vpop.f32.mrb[3].mxu1 }
 0x162   :  { %v1248_v47 = vpack.c.bf16 %v1004_v43, %v316_v45  ;;  %v1246_v48 = vpack.c.bf16 %v1039_v44, %v393_v46 }
 0x164   :  { %1247 = vmatprep.subr.bf16.mxu1 %v1246_v48 }
 0x165   :  { %1249 = vmatpush1.bf16.msra.mxu1 %v1248_v47 }
 0x168   :  { %802 = vmatmul.mubr.msk.f32.vlgmr.msra.gmra.mrb[8].mxu1 %vm479_vm0, %v76_v41 }
 0x169   :  { %633 = vmatprep.mubr.f32.mxu1 %v1415_v34 }
 0x16c   :  { %803 = vmatmul.mubr.msk.f32.gmra.mrb[10].mxu1 %vm479_vm0, %v77_v42 }
 0x16d   :  { %1079 = vmatprep.mubr.msk.f32.mxu1 %vm479_vm0, %v76_v41 }
 0x180   :  { %v1074_v49 = vpop.f32.mrb[4].mxu0 }
 0x181   :  { %v470_v50 = vpop.f32.mrb[5].mxu0 }
 0x182   :  { %v1250_v51 = vpack.c.bf16 %v1074_v49, %v470_v50 }
 0x184   :  { %1251 = vmatprep.subr.bf16.mxu1 %v1250_v51 }
 0x185   :  { %1253 = vmatpush3.bf16.msra.mxu1 %v1250_v51 }
 0x188   :  { %1080 = vmatmul.mubr.msk.f32.vlgmr.msra.gmra.mrb[12].mxu1 %vm479_vm0, %v77_v42 }
 0x189   :  { %1366 = shalt.err (!%p1363_p8)
}
 0x18a   :  { %s1367_s18 = scalar_lea.hbm %s1680_s4, 128 }
 0x18b   :  { %p1368_p9 = scmp.ne.s32.totalorder %s1680_s4, %s1367_s18  ;;  %p1371_p10 = scmp.lt.u32.totalorder %s1367_s18, %s1680_s4 }
 0x18d   :  { %p1373_p11 = pnand %p1371_p10, %p1368_p9 }
 0x18f   :  { %1376 = shalt.err (!%p1373_p11)
}
 0x190   :  { %778 = dma.vmem_to_hbm [thread:$0]  %s776_s30, 128, %s1680_s4, [#allocation4]  }
 0x191   :  { %s1417_s4 = smov [#allocation11]  }
 0x192   :  { %s785_s26 = sshll.u32 %s1417_s4, 4  ;;  %s786_s26 = int_to_ptr.vmem [resolvable:$true] %s785_s26 }
 0x193   :  { %s1377_s27 = scalar_lea.vmem %s786_s26, 128  ;;  %p1382_p13 = scmp.lt.s32.totalorder %s786_s26, %s786_s26 }
 0x194   :  { %p1378_p12 = scmp.ne.s32.totalorder %s786_s26, %s1377_s27  ;;  %p1383_p0 = scmp.lt.s32.totalorder %s1377_s27, %s1377_s27 }
 0x196   :  { %p1384_p1 = por %p1383_p0, %p1382_p13 }
 0x198   :  { %p1385_p2 = pnand %p1384_p1, %p1378_p12 }
 0x21b   :  { %v552_v57 = vpop.f32.mrb[4].mxu1 }
 0x21c   :  { %v727_v58 = vmul.f32 2.0, %v552_v57  ;;  %v554_v59 = vpop.f32.mrb[5].mxu1  ;;  %v715_v60 = vmul.f32 %v552_v57, %v552_v57 }
 0x21d   :  { %v719_v61 = vmul.f32 %v554_v59, %v554_v59  ;;  %v723_v62 = vmul.f32 %v554_v59, %v552_v57 }
 0x21e   :  { %v729_v63 = vmul.f32 %v727_v58, %v554_v59 }
 0x21f   :  { %v558_v0 = vpop.f32.mrb[6].mxu1  ;;  %v739_v1 = vadd.f32 %v719_v61, %v715_v60 }
 0x220   :  { %v728_v2 = vmul.f32 2.0, %v558_v0  ;;  %v560_v3 = vpop.f32.mrb[7].mxu1  ;;  %v716_v4 = vmul.f32 %v558_v0, %v558_v0  ;;  %v731_v39 = vadd.f32 0.0001, %v729_v63 }
 0x221   :  { %v720_v5 = vmul.f32 %v560_v3, %v560_v3  ;;  %v724_v6 = vmul.f32 %v560_v3, %v558_v0  ;;  %v741_v13 = vadd.f32 0.0001, %v739_v1 }
 0x222   :  { %v730_v7 = vmul.f32 %v728_v2, %v560_v3 }
 0x223   :  { %v740_v8 = vadd.f32 %v720_v5, %v716_v4 }
 0x224   :  { %v732_v37 = vadd.f32 0.0001, %v730_v7 }
 0x225   :  { %v742_v21 = vadd.f32 0.0001, %v740_v8 }
 0x23b   :  { %v629_v9 = vpop.f32.mrb[8].mxu1 }
 0x23c   :  { %v717_v10 = vsub.f32 %v629_v9, %v715_v60  ;;  %v631_v11 = vpop.f32.mrb[9].mxu1 }
 0x23d   :  { %v721_v12 = vsub.f32 %v631_v11, %v719_v61 }
 0x23f   :  { %v743_v14 = vadd.f32 %v721_v12, %v717_v10  ;;  %v635_v15 = vpop.f32.mrb[10].mxu1 }
 0x240   :  { %v718_v16 = vsub.f32 %v635_v15, %v716_v4  ;;  %v637_v17 = vpop.f32.mrb[11].mxu1 }
 0x241   :  { %v745_v18 = vadd.f32 0.0009, %v743_v14  ;;  %v722_v19 = vsub.f32 %v637_v17, %v720_v5 }
 0x243   :  { %v747_v20 = vmul.f32 %v745_v18, %v741_v13  ;;  %v744_v22 = vadd.f32 %v722_v19, %v718_v16 }
 0x245   :  { %v746_v23 = vadd.f32 0.0009, %v744_v22 }
 0x247   :  { %v748_v24 = vmul.f32 %v746_v23, %v742_v21 }
 0x249   :  { %1263 = vrcp.f32 %v748_v24 }
 0x24a   :  { %1265 = vrcp.f32 %v747_v20 }
 0x253   :  { %v1264_v25 = vpop.eup %1263 }
 0x254   :  { %v1266_v26 = vpop.eup %1265  ;;  %v752_v27 = vmul.f32 %v1264_v25, %v748_v24 }
 0x255   :  { %v751_v28 = vmul.f32 %v1266_v26, %v747_v20 }
 0x256   :  { %v754_v33 = vsub.f32 2.0, %v752_v27 }
 0x257   :  { %v753_v35 = vsub.f32 2.0, %v751_v28 }
 0x258   :  { %v756_v42 = vmul.f32 %v1264_v25, %v754_v33 }
 0x259   :  { %v755_v44 = vmul.f32 %v1266_v26, %v753_v35 }
 0x25b   :  { %v1081_v29 = vpop.f32.mrb[12].mxu1 }
 0x25c   :  { %v726_v30 = vsub.f32 %v1081_v29, %v724_v6  ;;  %v706_v31 = vpop.f32.mrb[13].mxu1 }
 0x25d   :  { %v725_v32 = vsub.f32 %v706_v31, %v723_v62 }
 0x25e   :  { %v734_v34 = vmul.f32 2.0, %v726_v30 }
 0x25f   :  { %v733_v36 = vmul.f32 2.0, %v725_v32 }
 0x260   :  { %v736_v38 = vadd.f32 0.0009, %v734_v34 }
 0x261   :  { %v735_v40 = vadd.f32 0.0009, %v733_v36 }
 0x262   :  { %v738_v41 = vmul.f32 %v736_v38, %v732_v37 }
 0x263   :  { %v737_v43 = vmul.f32 %v735_v40, %v731_v39 }
 0x264   :  { %v758_v45 = vmul.f32 %v756_v42, %v738_v41 }
 0x265   :  { %v757_v46 = vmul.f32 %v755_v44, %v737_v43 }
 0x267   :  { %v765_v47 = vadd.f32 %v758_v45, %v757_v46 }
 0x269   :  { %768 = vst [vmem:[#allocation11] sm:$0xff] %v765_v47 }
 0x26a   :  { %1388 = shalt.err (!%p1385_p2)
}
 0x26b   :  { %s1389_s0 = scalar_lea.hbm %s1681_s5, 128 }
 0x26c   :  { %p1390_p3 = scmp.ne.s32.totalorder %s1681_s5, %s1389_s0  ;;  %p1393_p4 = scmp.lt.u32.totalorder %s1389_s0, %s1681_s5 }
 0x26e   :  { %p1395_p5 = pnand %p1393_p4, %p1390_p3 }
 0x270   :  { %1398 = shalt.err (!%p1395_p5)
}
 0x271   :  { %788 = dma.vmem_to_hbm [thread:$0]  %s786_s26, 128, %s1681_s5, [#allocation12]  }
 0x272   :  { %1405 = dma.done.wait [#allocation4], 128  }
 0x273   :  { %1406 = vsyncadd [#allocation4], 4294967168 }
 0x274   :  { %1407 = dma.done.wait [#allocation12], 128  }
 0x275   :  { %1408 = vsyncadd [#allocation12], 4294967168 }
 0x276   :  { %795 = vsyncpa [#allocation3], 1 }
 0x277   :  { %796 = vsyncpa [#allocation6], 1 }
 0x278   :  { %797 = vsyncpa [#allocation9], 1 }
 0x279   :  { %798 = vsyncpa [#allocation4], 1 }
 0x27a   :  { %799 = vsyncpa [#allocation12], 1 }

// kernel: tpu_custom_call.1
= control target key start
LH: loop header
LB: loop body
LE: loop exit
PB: predicated region body
PF: predicated region fallthrough
CT: control target
= control target key end

     0   :  { %11 = vsyncpa [#allocation3], 0  ;;  %s1676_s0 = inlined_call_operand.hbm [shape: f32[1,16,128], index: 0, kind: input, shape index: {}]   ;;  %s1677_s1 = inlined_call_operand.hbm [shape: f32[1,16,128], index: 1, kind: input, shape index: {}]   ;;  %s1678_s2 = inlined_call_operand.hbm [shape: f32[16,16], index: 2, kind: input, shape index: {}]   ;;  %s1679_s3 = inlined_call_operand.hbm [shape: f32[128,128], index: 3, kind: input, shape index: {}]   ;;  %s1680_s4 = inlined_call_operand.hbm [shape: f32[1,8,128], index: 4, kind: output, shape index: {0}]   ;;  %s1681_s5 = inlined_call_operand.hbm [shape: f32[1,8,128], index: 5, kind: output, shape index: {1}]  }
   0x1   :  { %12 = vsyncpa [#allocation6], 0 }
   0x2   :  { %13 = vsyncpa [#allocation9], 0 }
   0x3   :  { %14 = vsyncpa [#allocation4], 0 }
   0x4   :  { %15 = vsyncpa [#allocation12], 0  ;;  %s1409_s18 = smov [#allocation5]   ;;  %s1410_s20 = smov [#allocation2]  }
   0x5   :  { %s33_s19 = sshll.u32 %s1409_s18, 4  ;;  %s21_s21 = sshll.u32 %s1410_s20, 4  ;;  %s34_s19 = int_to_ptr.vmem [resolvable:$true] %s33_s19  ;;  %s1448_s21 = int_to_ptr.vmem [resolvable:$true] %s21_s21 }
   0x6   :  { %s1267_s24 = scalar_lea.hbm %s1677_s1, 256 }
   0x7   :  { %p1268_p0 = scmp.ne.s32.totalorder %s1677_s1, %s1267_s24  ;;  %p1271_p1 = scmp.lt.u32.totalorder %s1267_s24, %s1677_s1 }
   0x9   :  { %p1273_p2 = pnand %p1271_p1, %p1268_p0 }
   0xb   :  { %1276 = shalt.err (!%p1273_p2)
}
   0xc   :  { %s1277_s29 = scalar_lea.vmem %s34_s19, 256  ;;  %p1282_p4 = scmp.lt.s32.totalorder %s34_s19, %s34_s19 }
   0xd   :  { %p1278_p3 = scmp.ne.s32.totalorder %s34_s19, %s1277_s29  ;;  %p1283_p5 = scmp.lt.s32.totalorder %s1277_s29, %s1277_s29 }
   0xf   :  { %p1284_p6 = por %p1283_p5, %p1282_p4 }
  0x11   :  { %p1285_p7 = pnand %p1284_p6, %p1278_p3 }
  0x13   :  { %1288 = shalt.err (!%p1285_p7)
}
  0x14   :  { %s1411_s30 = smov 128   ;;  %s1412_s6 = smov 8  }
  0x15   :  { %39 = dma.hbm_to_vmem [thread:$0]  %s1677_s1, 256, %s34_s19, [#allocation6], %s1411_s30, %s1411_s30, %s1412_s6  }
  0x16   :  { %s1289_s11 = scalar_lea.hbm %s1676_s0, 256 }
  0x17   :  { %p1290_p8 = scmp.ne.s32.totalorder %s1676_s0, %s1289_s11  ;;  %p1293_p9 = scmp.lt.u32.totalorder %s1289_s11, %s1676_s0 }
  0x19   :  { %p1295_p10 = pnand %p1293_p9, %p1290_p8 }
  0x1b   :  { %1298 = shalt.err (!%p1295_p10)
}
  0x1c   :  { %s1299_s16 = scalar_lea.vmem %s1448_s21, 256  ;;  %p1304_p12 = scmp.lt.s32.totalorder %s1448_s21, %s1448_s21 }
  0x1d   :  { %p1300_p11 = scmp.ne.s32.totalorder %s1448_s21, %s1299_s16  ;;  %p1305_p13 = scmp.lt.s32.totalorder %s1299_s16, %s1299_s16 }
  0x1f   :  { %p1306_p0 = por %p1305_p13, %p1304_p12 }
  0x21   :  { %p1307_p1 = pnand %p1306_p0, %p1300_p11 }
  0x23   :  { %1310 = shalt.err (!%p1307_p1)
}
  0x24   :  { %27 = dma.hbm_to_vmem [thread:$0]  %s1676_s0, 256, %s1448_s21, [#allocation3], %s1411_s30, %s1411_s30, %s1412_s6  }
  0x25   :  { %s1413_s18 = smov [#allocation7]   ;;  %s1414_s20 = smov [#allocation8]  }
  0x26   :  { %s45_s19 = sshll.u32 %s1413_s18, 4  ;;  %s57_s22 = sshll.u32 %s1414_s20, 4  ;;  %s46_s19 = int_to_ptr.vmem [resolvable:$true] %s45_s19  ;;  %s1485_s22 = int_to_ptr.vmem [resolvable:$true] %s57_s22 }
  0x27   :  { %s1311_s25 = scalar_lea.hbm %s1678_s2, 256 }
  0x28   :  { %p1312_p2 = scmp.ne.s32.totalorder %s1678_s2, %s1311_s25  ;;  %p1315_p3 = scmp.lt.u32.totalorder %s1311_s25, %s1678_s2 }
  0x2a   :  { %p1317_p4 = pnand %p1315_p3, %p1312_p2 }
  0x2c   :  { %1320 = shalt.err (!%p1317_p4)
}
  0x2d   :  { %s1321_s0 = scalar_lea.vmem %s46_s19, 256  ;;  %p1326_p6 = scmp.lt.s32.totalorder %s46_s19, %s46_s19 }
  0x2e   :  { %p1322_p5 = scmp.ne.s32.totalorder %s46_s19, %s1321_s0  ;;  %p1327_p7 = scmp.lt.s32.totalorder %s1321_s0, %s1321_s0 }
  0x30   :  { %p1328_p8 = por %p1327_p7, %p1326_p6 }
  0x32   :  { %p1329_p9 = pnand %p1328_p8, %p1322_p5 }
  0x34   :  { %1332 = shalt.err (!%p1329_p9)
}
  0x35   :  { %51 = dma.hbm_to_vmem [thread:$0]  %s1678_s2, 256, %s46_s19, [#allocation6], %s1411_s30, %s1411_s30, %s1412_s6  }
  0x36   :  { %s1333_s10 = scalar_lea.hbm %s1679_s3, 2048 }
  0x37   :  { %p1334_p10 = scmp.ne.s32.totalorder %s1679_s3, %s1333_s10  ;;  %p1337_p11 = scmp.lt.u32.totalorder %s1333_s10, %s1679_s3 }
  0x39   :  { %p1339_p12 = pnand %p1337_p11, %p1334_p10 }
  0x3b   :  { %1342 = shalt.err (!%p1339_p12)
}
  0x3c   :  { %s1343_s15 = scalar_lea.vmem %s1485_s22, 2048  ;;  %p1348_p0 = scmp.lt.s32.totalorder %s1485_s22, %s1485_s22 }
  0x3d   :  { %p1344_p13 = scmp.ne.s32.totalorder %s1485_s22, %s1343_s15  ;;  %p1349_p1 = scmp.lt.s32.totalorder %s1343_s15, %s1343_s15 }
  0x3f   :  { %p1350_p2 = por %p1349_p1, %p1348_p0 }
  0x41   :  { %p1351_p3 = pnand %p1350_p2, %p1344_p13 }
  0x43   :  { %1354 = shalt.err (!%p1351_p3)
}
  0x44   :  { %63 = dma.hbm_to_vmem [thread:$0]  %s1679_s3, 2048, %s1485_s22, [#allocation9], %s1411_s30, %s1411_s30, %s1412_s6  }
  0x45   :  { %1399 = dma.done.wait [#allocation3], 256  }
  0x46   :  { %1400 = vsyncadd [#allocation3], 4294967040 }
  0x47   :  { %1401 = dma.done.wait [#allocation6], 512  }
  0x48   :  { %1402 = vsyncadd [#allocation6], 4294966784 }
  0x49   :  { %1403 = dma.done.wait [#allocation9], 2048  }
  0x4a   :  { %1404 = vsyncadd [#allocation9], 4294965248  ;;  %v78_v0 = vld [vmem:[#allocation8] sm:$0xff]  ;;  %v79_v1 = vld [vmem:[#allocation8 + $0x8] sm:$0xff]  ;;  %v1415_v34 = vmov 0.0   ;;  %vm479_vm0 = vcmask 130048  }
  0x4b   :  { %v80_v2 = vld [vmem:[#allocation8 + $0x10] sm:$0xff]  ;;  %v1522_v3 = vpack.c.bf16 %v79_v1, %v78_v0  ;;  %v81_v4 = vld [vmem:[#allocation8 + $0x18] sm:$0xff]  ;;  %v82_v6 = vld [vmem:[#allocation8 + $0x20] sm:$0xff]  ;;  %s1416_s3 = smov [#allocation10]  }
  0x4c   :  { %v1524_v5 = vpack.c.bf16 %v81_v4, %v80_v2  ;;  %v83_v7 = vld [vmem:[#allocation8 + $0x28] sm:$0xff]  ;;  %v1534_v9 = vld [vmem:[#allocation2] sm:$0xff]  ;;  %v1536_v10 = vld [vmem:[#allocation5] sm:$0xff]  ;;  %s775_s30 = sshll.u32 %s1416_s3, 4  ;;  %s776_s30 = int_to_ptr.vmem [resolvable:$true] %s775_s30 }
  0x4d   :  { %1083 = vmatprep.subr.bf16.mxu0 %v1522_v3  ;;  %1115 = vmatprep.subr.bf16.mxu1 %v1522_v3  ;;  %v1532_v8 = vpack.c.bf16 %v83_v7, %v82_v6  ;;  %v84_v11 = vld [vmem:[#allocation8 + $0x30] sm:$0xff]  ;;  %v85_v12 = vld [vmem:[#allocation8 + $0x38] sm:$0xff]  ;;  %v86_v14 = vld [vmem:[#allocation8 + $0x40] sm:$0xff]  ;;  %v248_v28 = vmul.f32 %v1534_v9, %v1534_v9  ;;  %v325_v29 = vmul.f32 %v1536_v10, %v1536_v10  ;;  %s1355_s6 = scalar_lea.vmem %s776_s30, 128  ;;  %p1360_p5 = scmp.lt.s32.totalorder %s776_s30, %s776_s30 }
  0x4e   :  { %1085 = vmatpush3.bf16.msra.mxu0 %v1522_v3  ;;  %1117 = vmatpush3.bf16.msra.mxu1 %v1522_v3  ;;  %v1544_v13 = vpack.c.bf16 %v85_v12, %v84_v11  ;;  %v87_v15 = vld [vmem:[#allocation8 + $0x48] sm:$0xff]  ;;  %v88_v17 = vld [vmem:[#allocation8 + $0x50] sm:$0xff]  ;;  %v89_v18 = vld [vmem:[#allocation8 + $0x58] sm:$0xff]  ;;  %v402_v32 = vmul.f32 %v1536_v10, %v1534_v9  ;;  %v759_v52 = vsub.f32 %v1534_v9, %v1536_v10  ;;  %p1356_p4 = scmp.ne.s32.totalorder %s776_s30, %s1355_s6  ;;  %p1361_p6 = scmp.lt.s32.totalorder %s1355_s6, %s1355_s6 }
  0x4f   :  { %1087 = vmatprep.subr.bf16.mxu0 %v1524_v5  ;;  %1119 = vmatprep.subr.bf16.mxu1 %v1524_v5  ;;  %v1550_v16 = vpack.c.bf16 %v87_v15, %v86_v14  ;;  %v1556_v19 = vpack.c.bf16 %v89_v18, %v88_v17  ;;  %v90_v20 = vld [vmem:[#allocation8 + $0x60] sm:$0xff]  ;;  %v91_v21 = vld [vmem:[#allocation8 + $0x68] sm:$0xff]  ;;  %v92_v23 = vld [vmem:[#allocation8 + $0x70] sm:$0xff] }
  0x50   :  { %932 = vmatprep.mubr.f32.mxu0 %v1534_v9  ;;  %967 = vmatprep.mubr.f32.mxu1 %v1536_v10  ;;  %v1562_v22 = vpack.c.bf16 %v91_v21, %v90_v20  ;;  %v93_v24 = vld [vmem:[#allocation8 + $0x78] sm:$0xff]  ;;  %v1578_v27 = vld [vmem:[#allocation5 + $0x8] sm:$0xff]  ;;  %v76_v41 = vld [vmem:[#allocation7] sm:$0xff]  ;;  %v761_v54 = vand.u32 2147483647, %v759_v52  ;;  %p1362_p7 = por %p1361_p6, %p1360_p5 }
  0x51   :  { %v1568_v25 = vpack.c.bf16 %v93_v24, %v92_v23  ;;  %v1576_v26 = vld [vmem:[#allocation2 + $0x8] sm:$0xff]  ;;  %v326_v31 = vmul.f32 %v1578_v27, %v1578_v27 }
  0x52   :  { %1089 = vmatpush3.bf16.msra.mxu0 %v1524_v5  ;;  %1121 = vmatpush3.bf16.msra.mxu1 %v1524_v5  ;;  %v249_v30 = vmul.f32 %v1576_v26, %v1576_v26  ;;  %v403_v33 = vmul.f32 %v1578_v27, %v1576_v26  ;;  %v77_v42 = vld [vmem:[#allocation7 + $0x8] sm:$0xff]  ;;  %v760_v53 = vsub.f32 %v1576_v26, %v1578_v27  ;;  %p1363_p8 = pnand %p1362_p7, %p1356_p4 }
  0x53   :  { %1091 = vmatprep.subr.bf16.mxu0 %v1532_v8  ;;  %1123 = vmatprep.subr.bf16.mxu1 %v1532_v8 }
  0x54   :  { %v762_v55 = vand.u32 2147483647, %v760_v53 }
  0x56   :  { %1093 = vmatpush3.bf16.msra.mxu0 %v1532_v8  ;;  %1125 = vmatpush3.bf16.msra.mxu1 %v1532_v8  ;;  %v763_v56 = vadd.f32 %v762_v55, %v761_v54 }
  0x57   :  { %1095 = vmatprep.subr.bf16.mxu0 %v1544_v13  ;;  %1127 = vmatprep.subr.bf16.mxu1 %v1544_v13 }
  0x58   :  { %767 = vst [vmem:[#allocation10] sm:$0xff] %v763_v56 }
  0x5a   :  { %1097 = vmatpush3.bf16.msra.mxu0 %v1544_v13  ;;  %1129 = vmatpush3.bf16.msra.mxu1 %v1544_v13 }
  0x5b   :  { %1099 = vmatprep.subr.bf16.mxu0 %v1550_v16  ;;  %1131 = vmatprep.subr.bf16.mxu1 %v1550_v16 }
  0x5e   :  { %1101 = vmatpush3.bf16.msra.mxu0 %v1550_v16  ;;  %1133 = vmatpush3.bf16.msra.mxu1 %v1550_v16 }
  0x5f   :  { %1103 = vmatprep.subr.bf16.mxu0 %v1556_v19  ;;  %1135 = vmatprep.subr.bf16.mxu1 %v1556_v19 }
  0x62   :  { %1105 = vmatpush3.bf16.msra.mxu0 %v1556_v19  ;;  %1137 = vmatpush3.bf16.msra.mxu1 %v1556_v19 }
  0x63   :  { %1107 = vmatprep.subr.bf16.mxu0 %v1562_v22  ;;  %1139 = vmatprep.subr.bf16.mxu1 %v1562_v22 }
  0x66   :  { %1109 = vmatpush3.bf16.msra.mxu0 %v1562_v22  ;;  %1141 = vmatpush3.bf16.msra.mxu1 %v1562_v22 }
  0x67   :  { %1111 = vmatprep.subr.bf16.mxu0 %v1568_v25  ;;  %1143 = vmatprep.subr.bf16.mxu1 %v1568_v25 }
  0x6a   :  { %1113 = vmatpush3.bf16.msra.mxu0 %v1568_v25  ;;  %1145 = vmatpush3.bf16.msra.mxu1 %v1568_v25 }
  0x6b   :  { %1147 = vmatprep.subr.bf16.mxu0 %v1522_v3  ;;  %1179 = vmatprep.subr.bf16.mxu1 %v1522_v3 }
  0x6d   :  { %933 = vmatmul.mubr.f32.vlgmr.msra.gmra.mrb[0].mxu0 %v1576_v26  ;;  %968 = vmatmul.mubr.f32.vlgmr.msra.gmra.mrb[0].mxu1 %v1578_v27 }
  0x6e   :  { %1149 = vmatpush3.bf16.msra.mxu0 %v1522_v3  ;;  %1181 = vmatpush3.bf16.msra.mxu1 %v1522_v3 }
  0x6f   :  { %1151 = vmatprep.subr.bf16.mxu0 %v1524_v5  ;;  %1183 = vmatprep.subr.bf16.mxu1 %v1524_v5 }
  0x70   :  { %1002 = vmatprep.mubr.f32.mxu0 %v248_v28  ;;  %1037 = vmatprep.mubr.f32.mxu1 %v325_v29 }
  0x72   :  { %1153 = vmatpush3.bf16.msra.mxu0 %v1524_v5  ;;  %1185 = vmatpush3.bf16.msra.mxu1 %v1524_v5 }
  0x73   :  { %1155 = vmatprep.subr.bf16.mxu0 %v1532_v8  ;;  %1187 = vmatprep.subr.bf16.mxu1 %v1532_v8 }
  0x76   :  { %1157 = vmatpush3.bf16.msra.mxu0 %v1532_v8  ;;  %1189 = vmatpush3.bf16.msra.mxu1 %v1532_v8 }
  0x77   :  { %1159 = vmatprep.subr.bf16.mxu0 %v1544_v13  ;;  %1191 = vmatprep.subr.bf16.mxu1 %v1544_v13 }
  0x7a   :  { %1161 = vmatpush3.bf16.msra.mxu0 %v1544_v13  ;;  %1193 = vmatpush3.bf16.msra.mxu1 %v1544_v13 }
  0x7b   :  { %1163 = vmatprep.subr.bf16.mxu0 %v1550_v16  ;;  %1195 = vmatprep.subr.bf16.mxu1 %v1550_v16 }
  0x7e   :  { %1165 = vmatpush3.bf16.msra.mxu0 %v1550_v16  ;;  %1197 = vmatpush3.bf16.msra.mxu1 %v1550_v16 }
  0x7f   :  { %1167 = vmatprep.subr.bf16.mxu0 %v1556_v19  ;;  %1199 = vmatprep.subr.bf16.mxu1 %v1556_v19 }
  0x82   :  { %1169 = vmatpush3.bf16.msra.mxu0 %v1556_v19  ;;  %1201 = vmatpush3.bf16.msra.mxu1 %v1556_v19 }
  0x83   :  { %1171 = vmatprep.subr.bf16.mxu0 %v1562_v22  ;;  %1203 = vmatprep.subr.bf16.mxu1 %v1562_v22 }
  0x86   :  { %1173 = vmatpush3.bf16.msra.mxu0 %v1562_v22  ;;  %1205 = vmatpush3.bf16.msra.mxu1 %v1562_v22 }
  0x87   :  { %1175 = vmatprep.subr.bf16.mxu0 %v1568_v25  ;;  %1207 = vmatprep.subr.bf16.mxu1 %v1568_v25 }
  0x8a   :  { %1177 = vmatpush3.bf16.msra.mxu0 %v1568_v25  ;;  %1209 = vmatpush3.bf16.msra.mxu1 %v1568_v25 }
  0x8b   :  { %1211 = vmatprep.subr.bf16.mxu0 %v1522_v3 }
  0x8d   :  { %1003 = vmatmul.mubr.f32.vlgmr.msra.gmra.mrb[2].mxu0 %v249_v30  ;;  %1038 = vmatmul.mubr.f32.vlgmr.msra.gmra.mrb[2].mxu1 %v326_v31 }
  0x8e   :  { %1213 = vmatpush3.bf16.msra.mxu0 %v1522_v3  ;;  %1072 = vmatprep.mubr.f32.mxu0 %v402_v32 }
  0x8f   :  { %1215 = vmatprep.subr.bf16.mxu0 %v1524_v5  ;;  %550 = vmatprep.mubr.f32.mxu1 %v1415_v34 }
  0x92   :  { %1217 = vmatpush3.bf16.msra.mxu0 %v1524_v5 }
  0x93   :  { %1219 = vmatprep.subr.bf16.mxu0 %v1532_v8 }
  0x96   :  { %1221 = vmatpush3.bf16.msra.mxu0 %v1532_v8 }
  0x97   :  { %1223 = vmatprep.subr.bf16.mxu0 %v1544_v13 }
  0x9a   :  { %1225 = vmatpush3.bf16.msra.mxu0 %v1544_v13 }
  0x9b   :  { %1227 = vmatprep.subr.bf16.mxu0 %v1550_v16 }
  0x9e   :  { %1229 = vmatpush3.bf16.msra.mxu0 %v1550_v16 }
  0x9f   :  { %1231 = vmatprep.subr.bf16.mxu0 %v1556_v19 }
  0xa2   :  { %1233 = vmatpush3.bf16.msra.mxu0 %v1556_v19 }
  0xa3   :  { %1235 = vmatprep.subr.bf16.mxu0 %v1562_v22 }
  0xa6   :  { %1237 = vmatpush3.bf16.msra.mxu0 %v1562_v22 }
  0xa7   :  { %1239 = vmatprep.subr.bf16.mxu0 %v1568_v25 }
  0xaa   :  { %1241 = vmatpush3.bf16.msra.mxu0 %v1568_v25 }
  0xad   :  { %1073 = vmatmul.mubr.f32.vlgmr.msra.gmra.mrb[4].mxu0 %v403_v33 }
 0x140   :  { %v934_v35 = vpop.f32.mrb[0].mxu0  ;;  %v969_v36 = vpop.f32.mrb[0].mxu1 }
 0x141   :  { %v164_v37 = vpop.f32.mrb[1].mxu0  ;;  %v239_v38 = vpop.f32.mrb[1].mxu1 }
 0x142   :  { %v1244_v39 = vpack.c.bf16 %v934_v35, %v164_v37  ;;  %v1242_v40 = vpack.c.bf16 %v969_v36, %v239_v38 }
 0x144   :  { %1243 = vmatprep.subr.bf16.mxu1 %v1242_v40 }
 0x145   :  { %1245 = vmatpush1.bf16.msra.mxu1 %v1244_v39 }
 0x148   :  { %800 = vmatmul.mubr.msk.f32.vlgmr.msra.gmra.mrb[4].mxu1 %vm479_vm0, %v76_v41 }
 0x149   :  { %556 = vmatprep.mubr.f32.mxu1 %v1415_v34 }
 0x14c   :  { %801 = vmatmul.mubr.msk.f32.gmra.mrb[6].mxu1 %vm479_vm0, %v77_v42 }
 0x14d   :  { %627 = vmatprep.mubr.f32.mxu1 %v1415_v34 }
 0x160   :  { %v1004_v43 = vpop.f32.mrb[2].mxu0  ;;  %v1039_v44 = vpop.f32.mrb[2].mxu1 }
 0x161   :  { %v316_v45 = vpop.f32.mrb[3].mxu0  ;;  %v393_v46 = vpop.f32.mrb[3].mxu1 }
 0x162   :  { %v1248_v47 = vpack.c.bf16 %v1004_v43, %v316_v45  ;;  %v1246_v48 = vpack.c.bf16 %v1039_v44, %v393_v46 }
 0x164   :  { %1247 = vmatprep.subr.bf16.mxu1 %v1246_v48 }
 0x165   :  { %1249 = vmatpush1.bf16.msra.mxu1 %v1248_v47 }
 0x168   :  { %802 = vmatmul.mubr.msk.f32.vlgmr.msra.gmra.mrb[8].mxu1 %vm479_vm0, %v76_v41 }
 0x169   :  { %633 = vmatprep.mubr.f32.mxu1 %v1415_v34 }
 0x16c   :  { %803 = vmatmul.mubr.msk.f32.gmra.mrb[10].mxu1 %vm479_vm0, %v77_v42 }
 0x16d   :  { %1079 = vmatprep.mubr.msk.f32.mxu1 %vm479_vm0, %v76_v41 }
 0x180   :  { %v1074_v49 = vpop.f32.mrb[4].mxu0 }
 0x181   :  { %v470_v50 = vpop.f32.mrb[5].mxu0 }
 0x182   :  { %v1250_v51 = vpack.c.bf16 %v1074_v49, %v470_v50 }
 0x184   :  { %1251 = vmatprep.subr.bf16.mxu1 %v1250_v51 }
 0x185   :  { %1253 = vmatpush3.bf16.msra.mxu1 %v1250_v51 }
 0x188   :  { %1080 = vmatmul.mubr.msk.f32.vlgmr.msra.gmra.mrb[12].mxu1 %vm479_vm0, %v77_v42 }
 0x189   :  { %1366 = shalt.err (!%p1363_p8)
}
 0x18a   :  { %s1367_s18 = scalar_lea.hbm %s1680_s4, 128 }
 0x18b   :  { %p1368_p9 = scmp.ne.s32.totalorder %s1680_s4, %s1367_s18  ;;  %p1371_p10 = scmp.lt.u32.totalorder %s1367_s18, %s1680_s4 }
 0x18d   :  { %p1373_p11 = pnand %p1371_p10, %p1368_p9 }
 0x18f   :  { %1376 = shalt.err (!%p1373_p11)
}
 0x190   :  { %778 = dma.vmem_to_hbm [thread:$0]  %s776_s30, 128, %s1680_s4, [#allocation4]  }
 0x191   :  { %s1417_s4 = smov [#allocation11]  }
 0x192   :  { %s785_s26 = sshll.u32 %s1417_s4, 4  ;;  %s786_s26 = int_to_ptr.vmem [resolvable:$true] %s785_s26 }
 0x193   :  { %s1377_s27 = scalar_lea.vmem %s786_s26, 128  ;;  %p1382_p13 = scmp.lt.s32.totalorder %s786_s26, %s786_s26 }
 0x194   :  { %p1378_p12 = scmp.ne.s32.totalorder %s786_s26, %s1377_s27  ;;  %p1383_p0 = scmp.lt.s32.totalorder %s1377_s27, %s1377_s27 }
 0x196   :  { %p1384_p1 = por %p1383_p0, %p1382_p13 }
 0x198   :  { %p1385_p2 = pnand %p1384_p1, %p1378_p12 }
 0x21b   :  { %v552_v57 = vpop.f32.mrb[4].mxu1 }
 0x21c   :  { %v727_v58 = vmul.f32 2.0, %v552_v57  ;;  %v554_v59 = vpop.f32.mrb[5].mxu1  ;;  %v715_v60 = vmul.f32 %v552_v57, %v552_v57 }
 0x21d   :  { %v719_v61 = vmul.f32 %v554_v59, %v554_v59  ;;  %v723_v62 = vmul.f32 %v554_v59, %v552_v57 }
 0x21e   :  { %v729_v63 = vmul.f32 %v727_v58, %v554_v59 }
 0x21f   :  { %v558_v0 = vpop.f32.mrb[6].mxu1  ;;  %v739_v1 = vadd.f32 %v719_v61, %v715_v60 }
 0x220   :  { %v728_v2 = vmul.f32 2.0, %v558_v0  ;;  %v560_v3 = vpop.f32.mrb[7].mxu1  ;;  %v716_v4 = vmul.f32 %v558_v0, %v558_v0  ;;  %v731_v39 = vadd.f32 0.0001, %v729_v63 }
 0x221   :  { %v720_v5 = vmul.f32 %v560_v3, %v560_v3  ;;  %v724_v6 = vmul.f32 %v560_v3, %v558_v0  ;;  %v741_v13 = vadd.f32 0.0001, %v739_v1 }
 0x222   :  { %v730_v7 = vmul.f32 %v728_v2, %v560_v3 }
 0x223   :  { %v740_v8 = vadd.f32 %v720_v5, %v716_v4 }
 0x224   :  { %v732_v37 = vadd.f32 0.0001, %v730_v7 }
 0x225   :  { %v742_v21 = vadd.f32 0.0001, %v740_v8 }
 0x23b   :  { %v629_v9 = vpop.f32.mrb[8].mxu1 }
 0x23c   :  { %v717_v10 = vsub.f32 %v629_v9, %v715_v60  ;;  %v631_v11 = vpop.f32.mrb[9].mxu1 }
 0x23d   :  { %v721_v12 = vsub.f32 %v631_v11, %v719_v61 }
 0x23f   :  { %v743_v14 = vadd.f32 %v721_v12, %v717_v10  ;;  %v635_v15 = vpop.f32.mrb[10].mxu1 }
 0x240   :  { %v718_v16 = vsub.f32 %v635_v15, %v716_v4  ;;  %v637_v17 = vpop.f32.mrb[11].mxu1 }
 0x241   :  { %v745_v18 = vadd.f32 0.0009, %v743_v14  ;;  %v722_v19 = vsub.f32 %v637_v17, %v720_v5 }
 0x243   :  { %v747_v20 = vmul.f32 %v745_v18, %v741_v13  ;;  %v744_v22 = vadd.f32 %v722_v19, %v718_v16 }
 0x245   :  { %v746_v23 = vadd.f32 0.0009, %v744_v22 }
 0x247   :  { %v748_v24 = vmul.f32 %v746_v23, %v742_v21 }
 0x249   :  { %1263 = vrcp.f32 %v748_v24 }
 0x24a   :  { %1265 = vrcp.f32 %v747_v20 }
 0x253   :  { %v1264_v25 = vpop.eup %1263 }
 0x254   :  { %v1266_v26 = vpop.eup %1265  ;;  %v752_v27 = vmul.f32 %v1264_v25, %v748_v24 }
 0x255   :  { %v751_v28 = vmul.f32 %v1266_v26, %v747_v20 }
 0x256   :  { %v754_v33 = vsub.f32 2.0, %v752_v27 }
 0x257   :  { %v753_v35 = vsub.f32 2.0, %v751_v28 }
 0x258   :  { %v756_v42 = vmul.f32 %v1264_v25, %v754_v33 }
 0x259   :  { %v755_v44 = vmul.f32 %v1266_v26, %v753_v35 }
 0x25b   :  { %v1081_v29 = vpop.f32.mrb[12].mxu1 }
 0x25c   :  { %v726_v30 = vsub.f32 %v1081_v29, %v724_v6  ;;  %v706_v31 = vpop.f32.mrb[13].mxu1 }
 0x25d   :  { %v725_v32 = vsub.f32 %v706_v31, %v723_v62 }
 0x25e   :  { %v734_v34 = vmul.f32 2.0, %v726_v30 }
 0x25f   :  { %v733_v36 = vmul.f32 2.0, %v725_v32 }
 0x260   :  { %v736_v38 = vadd.f32 0.0009, %v734_v34 }
 0x261   :  { %v735_v40 = vadd.f32 0.0009, %v733_v36 }
 0x262   :  { %v738_v41 = vmul.f32 %v736_v38, %v732_v37 }
 0x263   :  { %v737_v43 = vmul.f32 %v735_v40, %v731_v39 }
 0x264   :  { %v758_v45 = vmul.f32 %v756_v42, %v738_v41 }
 0x265   :  { %v757_v46 = vmul.f32 %v755_v44, %v737_v43 }
 0x267   :  { %v765_v47 = vadd.f32 %v758_v45, %v757_v46 }
 0x269   :  { %768 = vst [vmem:[#allocation11] sm:$0xff] %v765_v47 }
 0x26a   :  { %1388 = shalt.err (!%p1385_p2)
}
 0x26b   :  { %s1389_s0 = scalar_lea.hbm %s1681_s5, 128 }
 0x26c   :  { %p1390_p3 = scmp.ne.s32.totalorder %s1681_s5, %s1389_s0  ;;  %p1393_p4 = scmp.lt.u32.totalorder %s1389_s0, %s1681_s5 }
 0x26e   :  { %p1395_p5 = pnand %p1393_p4, %p1390_p3 }
 0x270   :  { %1398 = shalt.err (!%p1395_p5)
}
 0x271   :  { %788 = dma.vmem_to_hbm [thread:$0]  %s786_s26, 128, %s1681_s5, [#allocation12]  }
 0x272   :  { %1405 = dma.done.wait [#allocation4], 128  }
 0x273   :  { %1406 = vsyncadd [#allocation4], 4294967168 }
 0x274   :  { %1407 = dma.done.wait [#allocation12], 128  }
 0x275   :  { %1408 = vsyncadd [#allocation12], 4294967168 }
 0x276   :  { %795 = vsyncpa [#allocation3], 1 }
 0x277   :  { %796 = vsyncpa [#allocation6], 1 }
 0x278   :  { %797 = vsyncpa [#allocation9], 1 }
 0x279   :  { %798 = vsyncpa [#allocation4], 1 }
 0x27a   :  { %799 = vsyncpa [#allocation12], 1 }

</bundles_post_ra>
